<compile_context>
chip_gen: v7x
topology: tpu7x:2x2x1
jax: 0.10.0
libtpu: 0.0.40
codegen_flags: <defaults>
</compile_context>

<pallas_src>
import functools

import numpy as np
import jax
import jax.numpy as jnp
from jax import lax
from jax.experimental import pallas as pl
from jax.experimental.pallas import tpu as pltpu


def _round_up(v, m):
    return ((v + m - 1) // m) * m


# ----------------------------------------------------------------------------
# Fused whole-walk Pallas kernel (one batch element per grid step)
# ----------------------------------------------------------------------------
def _walk_kernel(xk_ref, adj_ref, cur0_ref, pre0_ref, wblk_ref, wpre_ref,
                 mw_ref, gperm_ref, ab_ref, mb_ref, out_ref, *, c, k, n, q, steps):
    """Whole walk for one batch element, VMEM resident.

    Lane-dense layout: curves q (padded to x128) on lanes; channels/neighbors
    on sublanes.
      xk    (1, k*c, n)  bf16  precomputed neighbor features
      adj   (1, k, n)    f32   neighbor indices (exact ints), neighbor-first
      cur0  (1, 1, q)    f32   starting point index per curve
      pre0  (1, c, q)    f32   step-0 pre_feature (x gathered at cur0 in wrapper)
      wblk  (k, k*c)     f32   block-diag replication of agent "pick" weights
      wpre  (c, 1)       f32   agent weights on the pre_feature half
      mw    (2, 2*c)     f32   momentum_mlp weights (BN folded)
      gperm (2q, 2q)     f32   constant permutation for torch's .view(bn,1,Q,2)
      ab/mb SMEM               folded biases
      out   (1, steps, c, q)   selected neighbor features per step
    """
    xk = xk_ref[0]                # (k*c, n) bf16
    adj = adj_ref[0]              # (k, n)   f32
    wblk = wblk_ref[...]          # (k, k*c)
    w_pre = wpre_ref[...]         # (c, 1)
    mw = mw_ref[...]              # (2, 2c)
    gperm = gperm_ref[...]        # (2q, 2q)
    ab = ab_ref[0]
    mb0 = mb_ref[0]
    mb1 = mb_ref[1]

    # hoisted point-index iota used by every per-step one-hot
    iota_nq = lax.broadcasted_iota(jnp.int32, (n, q), 0).astype(jnp.float32)

    def gather_and_select(cur_idx, pre_feat, cur_feat, with_crossover):
        # ONE one-hot per step (single compare, two casts) feeds both gathers.
        onehot = iota_nq == cur_idx                                         # (n, q) bool
        # All k neighbor features in a single wide bf16 MXU matmul.
        neigh_all = jnp.dot(xk, onehot.astype(jnp.bfloat16),
                            preferred_element_type=jnp.float32)             # (k*c, q)
        # Index gather stays f32 (indices > 256 are not exact in bf16).
        pick_idx = jnp.dot(adj, onehot.astype(jnp.float32),
                           preferred_element_type=jnp.float32)              # (k, q)
        # agent_mlp logits for all k neighbors with one block-diag MXU matmul
        wpre_dot = jnp.sum(pre_feat * w_pre, axis=0, keepdims=True)         # (1, q)
        logits = (jnp.dot(wblk, neigh_all, preferred_element_type=jnp.float32)
                  + wpre_dot + ab)                                          # (k, q)
        if with_crossover:
            cv = cur_feat - pre_feat                                        # (c, q)
            n1sq = jnp.sum(cv * cv, axis=0, keepdims=True)                  # (1, q)
        best_val = best_feat = best_pick = None
        for j in range(k):                         # unrolled: k is small & static
            pv = neigh_all[j * c:(j + 1) * c, :]                            # (c, q)
            lg = logits[j:j + 1, :]                                         # (1, q)
            if with_crossover:
                # crossover suppression: cosine(cur-pre_new, neighbor-cur) via rsqrt
                diff = pv - cur_feat
                dotv = jnp.sum(diff * cv, axis=0, keepdims=True)
                n2sq = jnp.sum(diff * diff, axis=0, keepdims=True)
                d = jnp.clip(1.0 + dotv * lax.rsqrt(jnp.maximum(n1sq * n2sq, 1e-16)),
                             0.0, 1.0)
                lg = lg * d
            if j == 0:
                best_val, best_feat, best_pick = lg, pv, pick_idx[0:1, :]
            else:
                better = lg > best_val             # strict '>' keeps FIRST argmax (torch)
                best_val = jnp.where(better, lg, best_val)
                best_feat = jnp.where(better, pv, best_feat)
                best_pick = jnp.where(better, pick_idx[j:j + 1, :], best_pick)
        return best_feat, best_pick

    # ---- step 0 (peeled: no momentum mixing, no crossover suppression) ----
    pre_feat0 = pre0_ref[0]                        # (c, q)
    cur_feat0, cur_idx0 = gather_and_select(cur0_ref[0], pre_feat0, None, False)
    out_ref[0, 0] = cur_feat0

    # ---- steps 1..L-1 (fori_loop bounds live ranges for long walks) ----
    def body(step, carry):
        cur_feat, pre_feat, cur_idx = carry
        # momentum_mlp (1x1 conv + folded BN) + 2-way softmax computed as sigmoid
        cat = jnp.concatenate([cur_feat, pre_feat], axis=0)                 # (2c, q)
        lg = jnp.dot(mw, cat, preferred_element_type=jnp.float32)           # (2, q)
        l0 = lg[0:1, :] + mb0
        l1 = lg[1:2, :] + mb1
        s0 = pl.reciprocal(1.0 + jnp.exp(l1 - l0), approx=False)            # (1, q)
        s1 = 1.0 - s0
        # torch's `.view(bn,1,Q,2)` strided reinterpretation of the contiguous
        # (bn,2,Q) softmax: one constant permutation matmul producing [att0|att1].
        flat = jnp.concatenate([s0, s1], axis=1)                            # (1, 2q)
        att = jnp.dot(flat, gperm, preferred_element_type=jnp.float32)      # (1, 2q)
        pre_new = cur_feat * att[:, :q] + pre_feat * att[:, q:]
        new_feat, new_idx = gather_and_select(cur_idx, pre_new, cur_feat, True)
        out_ref[0, pl.ds(step, 1)] = new_feat[None]
        return new_feat, pre_new, new_idx

    lax.fori_loop(1, steps, body, (cur_feat0, pre_feat0, cur_idx0))


def _vmem_limit_bytes(c_pad, k, n_pad, q_pad, steps):
    mib = 1 << 20
    # double-buffered pipelined blocks
    b = 2 * (k * c_pad * n_pad * 2 + k * n_pad * 4 + q_pad * 4
             + c_pad * q_pad * 4 + steps * c_pad * q_pad * 4)
    # broadcast weights / permutation matrix (double-buffered)
    b += (k * k * c_pad + c_pad + 4 * c_pad + 4 * q_pad * q_pad) * 4 * 2
    # in-kernel temporaries (one-hot, neighbor slab, carries) — rough estimate
    b += (2 * n_pad * q_pad + 2 * k * c_pad * q_pad + 8 * c_pad * q_pad) * 4
    return int(min(max(b + 8 * mib, 32 * mib), 112 * mib))


def _build_walk(bn, c_pad, n_pad, k, q_pad, steps):
    kern = functools.partial(_walk_kernel, c=c_pad, k=k, n=n_pad, q=q_pad, steps=steps)
    return pl.pallas_call(
        kern,
        grid=(bn,),
        in_specs=[
            pl.BlockSpec((1, k * c_pad, n_pad), lambda b: (b, 0, 0)),   # xk (bf16)
            pl.BlockSpec((1, k, n_pad), lambda b: (b, 0, 0)),           # adj (f32 ints)
            pl.BlockSpec((1, 1, q_pad), lambda b: (b, 0, 0)),           # starting indices
            pl.BlockSpec((1, c_pad, q_pad), lambda b: (b, 0, 0)),       # step-0 pre_feature
            pl.BlockSpec((k, k * c_pad), lambda b: (0, 0)),             # block-diag agent W
            pl.BlockSpec((c_pad, 1), lambda b: (0, 0)),                 # agent W (pre half)
            pl.BlockSpec((2, 2 * c_pad), lambda b: (0, 0)),             # momentum W
            pl.BlockSpec((2 * q_pad, 2 * q_pad), lambda b: (0, 0)),     # view-quirk perm
            pl.BlockSpec(memory_space=pltpu.MemorySpace.SMEM),          # agent bias (1,)
            pl.BlockSpec(memory_space=pltpu.MemorySpace.SMEM),          # momentum bias (2,)
        ],
        out_specs=pl.BlockSpec((1, steps, c_pad, q_pad), lambda b: (b, 0, 0, 0)),
        out_shape=jax.ShapeDtypeStruct((bn, steps, c_pad, q_pad), jnp.float32),
        compiler_params=pltpu.CompilerParams(
            dimension_semantics=("parallel",),
            vmem_limit_bytes=_vmem_limit_bytes(c_pad, k, n_pad, q_pad, steps)),
    )


def _view_quirk_perm(Q, q_pad):
    """Constant (2*q_pad, 2*q_pad) permutation: flat=[s0|s1] @ G = [att0|att1],
    reproducing torch's `.view(bn,1,Q,2)` of the contiguous (bn,2,Q) softmax."""
    g = np.zeros((2 * q_pad, 2 * q_pad), np.float32)
    for qq in range(Q):
        for r in range(2):
            i = 2 * qq + r
            row = i if i < Q else q_pad + (i - Q)
            col = qq if r == 0 else q_pad + qq
            g[row, col] = 1.0
    return jnp.asarray(g)


# ----------------------------------------------------------------------------
# Forward pass wrapper (layout plumbing + walk-independent precompute only)
# ----------------------------------------------------------------------------
def walk_forward(xyz, x, adj, cur, params, *, curve_num, curve_length, k):
    # `xyz.transpose(1,2).contiguous` in the torch forward is a bound-method
    # reference (never called); xyz does not influence the output.
    del xyz
    bn, c, n = x.shape
    Q, L = curve_num, curve_length
    c_pad = _round_up(c, 8)
    q_pad = _round_up(Q, 128)
    n_pad = _round_up(n, 128)

    x32 = jnp.pad(x.astype(jnp.float32), ((0, 0), (0, c_pad - c), (0, 0)))   # (bn,c_pad,n)

    # Precompute the neighbor-feature slab xk[b, j*c_pad+c0, p] = x[b, c0, adj[b,p,j]]
    # (walk-independent), so every step needs a single wide gather matmul in-kernel.
    def per_batch_neighbors(xb, adjb):
        g = jnp.take(xb, adjb, axis=1)              # (c_pad, n, k)
        return jnp.transpose(g, (2, 0, 1))          # (k, c_pad, n)
    xk = jax.vmap(per_batch_neighbors)(x32, adj).reshape(bn, k * c_pad, n)
    xk = jnp.pad(xk, ((0, 0), (0, 0), (0, n_pad - n))).astype(jnp.bfloat16)

    adj_f = jnp.pad(jnp.transpose(adj, (0, 2, 1)).astype(jnp.float32),
                    ((0, 0), (0, 0), (0, n_pad - n)))                        # (bn,k,n_pad)

    cur_q = cur.reshape(bn, Q)
    cur0 = jnp.pad(cur_q[:, None, :].astype(jnp.float32),
                   ((0, 0), (0, 0), (0, q_pad - Q)))                         # (bn,1,q_pad)

    # step-0 pre_feature = x at the starting points (walk-independent wrapper gather)
    pre0 = jax.vmap(lambda xb, cb: jnp.take(xb, cb, axis=1))(x32, cur_q)     # (bn,c_pad,Q)
    pre0 = jnp.pad(pre0, ((0, 0), (0, 0), (0, q_pad - Q)))                   # (bn,c_pad,q_pad)

    agent_w = params["agent_w"]                                              # (1, 2c)
    w_pick = jnp.pad(agent_w[0, :c], (0, c_pad - c))
    w_pre = jnp.pad(agent_w[0, c:], (0, c_pad - c)).reshape(c_pad, 1)
    wblk = jnp.kron(jnp.eye(k, dtype=jnp.float32), w_pick.reshape(1, c_pad)) # (k, k*c_pad)

    mom_w = params["mom_w"]                                                  # (2, 2c)
    mw_full = jnp.zeros((2, 2 * c_pad), jnp.float32)
    mw_full = mw_full.at[:, :c].set(mom_w[:, :c]).at[:, c_pad:c_pad + c].set(mom_w[:, c:])

    gperm = _view_quirk_perm(Q, q_pad)

    out = _build_walk(bn, c_pad, n_pad, k, q_pad, L)(
        xk, adj_f, cur0, pre0, wblk, w_pre, mw_full, gperm,
        params["agent_b"], params["mom_b"])                                  # (bn,L,c_pad,q_pad)
    return jnp.transpose(out, (0, 2, 3, 1))[:, :c, :Q, :]                    # (bn, c, Q, L)


# ----------------------------------------------------------------------------
# Deterministic parameter init (Conv weights + eval-mode BatchNorm folded in)
# ----------------------------------------------------------------------------
def init_params(key, in_channel):
    c = in_channel
    eps = 1e-5
    k1, k2, k3, k4, k5, k6 = jax.random.split(key, 6)
    agent_conv_w = jax.random.normal(k1, (1, 2 * c), jnp.float32) / np.sqrt(2 * c)
    mom_conv_w = jax.random.normal(k2, (2, 2 * c), jnp.float32) / np.sqrt(2 * c)
    agent_gamma = 1.0 + 0.1 * jax.random.normal(k3, (1,), jnp.float32)
    agent_beta = 0.1 * jax.random.normal(k4, (1,), jnp.float32)
    mom_gamma = 1.0 + 0.1 * jax.random.normal(k5, (2,), jnp.float32)
    mom_beta = 0.1 * jax.random.normal(k6, (2,), jnp.float32)
    agent_mean, agent_var = jnp.zeros((1,)), jnp.ones((1,))     # running stats (defaults)
    mom_mean, mom_var = jnp.zeros((2,)), jnp.ones((2,))

    agent_scale = agent_gamma / jnp.sqrt(agent_var + eps)
    mom_scale = mom_gamma / jnp.sqrt(mom_var + eps)
    return {
        "agent_w": agent_conv_w * agent_scale[:, None],
        "agent_b": (agent_beta - agent_mean * agent_scale).astype(jnp.float32),
        "mom_w": mom_conv_w * mom_scale[:, None],
        "mom_b": (mom_beta - mom_mean * mom_scale).astype(jnp.float32),
    }


# ----------------------------------------------------------------------------
# Pure-JAX reference mirroring the torch code (for validation)
# ----------------------------------------------------------------------------
def walk_reference(x, adj, cur, params, *, curve_num, curve_length, k):
    bn, c, n = x.shape
    Q = curve_num
    agent_w, agent_b = params["agent_w"], params["agent_b"]
    mom_w, mom_b = params["mom_w"], params["mom_b"]
    x_t = jnp.transpose(x, (0, 2, 1))
    flatten_x = x_t.reshape(bn * n, c)
    offs = jnp.arange(bn, dtype=adj.dtype) * n
    tmp_adj = (adj + offs[:, None, None]).reshape(bn * n, k)
    flatten_cur = (cur + offs[:, None, None]).reshape(-1)
    curves = []
    cur_feature = pre_feature = cur_feature_cos = pre_feature_cos = None
    for step in range(curve_length):
        if step == 0:
            sp = flatten_x[flatten_cur]
            pre_feature = jnp.transpose(sp.reshape(bn, Q, c, 1), (0, 2, 1, 3))
        else:
            cat1 = jnp.concatenate([cur_feature[..., 0], pre_feature[..., 0]], axis=1)
            logits = jnp.einsum('oc,bcq->boq', mom_w, cat1) + mom_b[None, :, None]
            att = jax.nn.softmax(logits, axis=1).reshape(bn, 1, Q, 2)
            cat2 = jnp.concatenate([cur_feature, pre_feature], axis=-1)
            pre_feature = jnp.sum(cat2 * att, axis=-1, keepdims=True)
            pre_feature_cos = jnp.transpose(pre_feature, (0, 2, 1, 3)).reshape(bn * Q, c)
        pick_idx = tmp_adj[flatten_cur]
        pick_values = flatten_x[pick_idx.reshape(-1)]
        pick_values_cos = pick_values.reshape(bn * Q, k, c)
        pick_values4 = pick_values_cos.reshape(bn, Q, k, c)
        pick_values_cos_t = jnp.transpose(pick_values_cos, (0, 2, 1))
        pick_perm = jnp.transpose(pick_values4, (0, 3, 1, 2))
        pre_expand = jnp.broadcast_to(pre_feature, pick_perm.shape)
        cat3 = jnp.concatenate([pick_perm, pre_expand], axis=1)
        logits2 = jnp.einsum('oc,bcqk->boqk', agent_w, cat3) + agent_b[None, :, None, None]
        if step != 0:
            cv = cur_feature_cos - pre_feature_cos
            neigh = pick_values_cos_t - cur_feature_cos[:, :, None]
            dot = jnp.einsum('ic,ick->ik', cv, neigh)
            n1 = jnp.linalg.norm(cv, axis=1, keepdims=True)
            n2 = jnp.linalg.norm(neigh, axis=1)
            d = jnp.clip(1.0 + dot / jnp.maximum(n1 * n2, 1e-8), 0.0, 1.0)
            logits2 = logits2 * d.reshape(bn, Q, k)[:, None]
        ind = jnp.argmax(logits2, axis=-1)
        onehot = jax.nn.one_hot(ind, k, dtype=logits2.dtype)
        cur_feature = jnp.sum(pick_perm * onehot, axis=-1, keepdims=True)
        cur_feature_cos = jnp.transpose(cur_feature, (0, 2, 1, 3)).reshape(bn * Q, c)
        flatten_cur = jnp.take_along_axis(pick_idx, ind.reshape(-1, 1), axis=1)[:, 0]
        curves.append(cur_feature)
    return jnp.concatenate(curves, axis=-1)


# ----------------------------------------------------------------------------
if __name__ == "__main__":
    key = jax.random.PRNGKey(0)
    bn, in_channel, n_points = 2, 8, 32
    k_nn, curve_num, curve_length = 4, 8, 4

    kx, kz, ka, kc, kp = jax.random.split(key, 5)
    x = jax.random.normal(kx, (bn, in_channel, n_points), jnp.float32)
    # The kernel gathers features in bf16 (MXU fast path); use bf16-representable
    # test values so the f32 reference comparison stays tight (gather is then exact).
    x = x.astype(jnp.bfloat16).astype(jnp.float32)
    xyz = jax.random.normal(kz, (bn, 3, n_points), jnp.float32)         # unused by forward
    adj = jax.random.randint(ka, (bn, n_points, k_nn), 0, n_points, dtype=jnp.int32)
    cur0 = jax.random.randint(kc, (bn, curve_num, 1), 0, n_points, dtype=jnp.int32)
    params = init_params(kp, in_channel)

    out = walk_forward(xyz, x, adj, cur0, params,
                       curve_num=curve_num, curve_length=curve_length, k=k_nn)
    out = jax.block_until_ready(out)

    ref = walk_reference(x, adj, cur0, params,
                         curve_num=curve_num, curve_length=curve_length, k=k_nn)
    assert out.shape == (bn, in_channel, curve_num, curve_length)
    np.testing.assert_allclose(np.asarray(out), np.asarray(ref), rtol=1e-3, atol=1e-3)
    print("KERNEL_OK")
</pallas_src>

<mosaic_0001>
module attributes {stable_mosaic.version = 11 : i64} {
  func.func @_walk_kernel(%arg0: i32, %arg1: memref<1x32x128xbf16, #tpu.memory_space<vmem>>, %arg2: memref<1x4x128xf32, #tpu.memory_space<vmem>>, %arg3: memref<1x1x128xf32, #tpu.memory_space<vmem>>, %arg4: memref<1x8x128xf32, #tpu.memory_space<vmem>>, %arg5: memref<4x32xf32, #tpu.memory_space<vmem>>, %arg6: memref<8x1xf32, #tpu.memory_space<vmem>>, %arg7: memref<2x16xf32, #tpu.memory_space<vmem>>, %arg8: memref<256x256xf32, #tpu.memory_space<vmem>>, %arg9: memref<1xf32, #tpu.memory_space<smem>>, %arg10: memref<2xf32, #tpu.memory_space<smem>>, %arg11: memref<1x4x8x128xf32, #tpu.memory_space<vmem>>) attributes {dimension_semantics = [#tpu.dimension_semantics<parallel>], iteration_bounds = array<i64: 2>, scalar_prefetch = 0 : i64, scratch_operands = 0 : i64, tpu.core_type = #tpu.core_type<tc>, window_params = [{transform_indices = @transform_0, window_bounds = array<i64: 1, 32, 128>}, {transform_indices = @transform_1, window_bounds = array<i64: 1, 4, 128>}, {transform_indices = @transform_2, window_bounds = array<i64: 1, 1, 128>}, {transform_indices = @transform_3, window_bounds = array<i64: 1, 8, 128>}, {pipeline_mode = #tpu.pipeline_mode<synchronous>, transform_indices = @transform_4, window_bounds = array<i64: 4, 32>}, {pipeline_mode = #tpu.pipeline_mode<synchronous>, transform_indices = @transform_5, window_bounds = array<i64: 8, 1>}, {pipeline_mode = #tpu.pipeline_mode<synchronous>, transform_indices = @transform_6, window_bounds = array<i64: 2, 16>}, {pipeline_mode = #tpu.pipeline_mode<synchronous>, transform_indices = @transform_7, window_bounds = array<i64: 256, 256>}, {transform_indices = @transform_8, window_bounds = array<i64: 1>}, {transform_indices = @transform_9, window_bounds = array<i64: 2>}, {transform_indices = @transform_10, window_bounds = array<i64: 1, 4, 8, 128>}]} {
    %c0 = arith.constant 0 : index
    %c0_0 = arith.constant 0 : index
    %c0_1 = arith.constant 0 : index
    %0 = vector.load %arg1[%c0, %c0_0, %c0_1] : memref<1x32x128xbf16, #tpu.memory_space<vmem>>, vector<1x32x128xbf16>
    %1 = vector.shape_cast %0 : vector<1x32x128xbf16> to vector<32x128xbf16>
    %c0_2 = arith.constant 0 : index
    %c0_3 = arith.constant 0 : index
    %c0_4 = arith.constant 0 : index
    %2 = vector.load %arg2[%c0_2, %c0_3, %c0_4] : memref<1x4x128xf32, #tpu.memory_space<vmem>>, vector<1x4x128xf32>
    %3 = vector.shape_cast %2 : vector<1x4x128xf32> to vector<4x128xf32>
    %c0_5 = arith.constant 0 : index
    %c0_6 = arith.constant 0 : index
    %4 = vector.load %arg5[%c0_5, %c0_6] : memref<4x32xf32, #tpu.memory_space<vmem>>, vector<4x32xf32>
    %c0_7 = arith.constant 0 : index
    %c0_8 = arith.constant 0 : index
    %5 = vector.load %arg6[%c0_7, %c0_8] : memref<8x1xf32, #tpu.memory_space<vmem>>, vector<8x1xf32>
    %c0_9 = arith.constant 0 : index
    %c0_10 = arith.constant 0 : index
    %6 = vector.load %arg7[%c0_9, %c0_10] : memref<2x16xf32, #tpu.memory_space<vmem>>, vector<2x16xf32>
    %c0_11 = arith.constant 0 : index
    %c0_12 = arith.constant 0 : index
    %7 = vector.load %arg8[%c0_11, %c0_12] : memref<256x256xf32, #tpu.memory_space<vmem>>, vector<256x256xf32>
    %c0_13 = arith.constant 0 : index
    %8 = memref.load %arg9[%c0_13] : memref<1xf32, #tpu.memory_space<smem>>
    %c0_14 = arith.constant 0 : index
    %9 = memref.load %arg10[%c0_14] : memref<2xf32, #tpu.memory_space<smem>>
    %c1 = arith.constant 1 : index
    %10 = memref.load %arg10[%c1] : memref<2xf32, #tpu.memory_space<smem>>
    %11 = tpu.iota {dimensions = array<i32: 0>} : vector<128x128xi32>
    %12 = arith.sitofp %11 : vector<128x128xi32> to vector<128x128xf32>
    %c0_15 = arith.constant 0 : index
    %c0_16 = arith.constant 0 : index
    %c0_17 = arith.constant 0 : index
    %13 = vector.load %arg4[%c0_15, %c0_16, %c0_17] : memref<1x8x128xf32, #tpu.memory_space<vmem>>, vector<1x8x128xf32>
    %14 = vector.shape_cast %13 : vector<1x8x128xf32> to vector<8x128xf32>
    %c0_18 = arith.constant 0 : index
    %c0_19 = arith.constant 0 : index
    %c0_20 = arith.constant 0 : index
    %15 = vector.load %arg3[%c0_18, %c0_19, %c0_20] : memref<1x1x128xf32, #tpu.memory_space<vmem>>, vector<1x1x128xf32>
    %16 = vector.shape_cast %15 : vector<1x1x128xf32> to vector<1x128xf32>
    %17 = vector.broadcast %16 : vector<1x128xf32> to vector<128x128xf32>
    %18 = arith.cmpf oeq, %12, %17 : vector<128x128xf32>
    %19 = arith.extui %18 : vector<128x128xi1> to vector<128x128xi32>
    %20 = arith.sitofp %19 : vector<128x128xi32> to vector<128x128xf32>
    %21 = arith.truncf %20 : vector<128x128xf32> to vector<128x128xbf16>
    %cst = arith.constant dense<0.000000e+00> : vector<32x128xf32>
    %22 = tpu.matmul %1, %21, %cst {dimension_numbers = #tpu.dot_dimension_numbers<[1], [0], [0], [1], [0, 0, 1, 1], [], []>} : vector<32x128xbf16>, vector<128x128xbf16>, vector<32x128xf32> -> vector<32x128xf32>
    %23 = arith.extui %18 : vector<128x128xi1> to vector<128x128xi32>
    %24 = arith.sitofp %23 : vector<128x128xi32> to vector<128x128xf32>
    %cst_21 = arith.constant dense<0.000000e+00> : vector<4x128xf32>
    %25 = tpu.matmul %3, %24, %cst_21 {dimension_numbers = #tpu.dot_dimension_numbers<[1], [0], [0], [1], [0, 0, 1, 1], [], []>} : vector<4x128xf32>, vector<128x128xf32>, vector<4x128xf32> -> vector<4x128xf32>
    %26 = vector.broadcast %5 : vector<8x1xf32> to vector<8x128xf32>
    %27 = arith.mulf %14, %26 : vector<8x128xf32>
    %cst_22 = arith.constant dense<0.000000e+00> : vector<128xf32>
    %28 = vector.multi_reduction <add>, %27, %cst_22 [0] : vector<8x128xf32> to vector<128xf32>
    %29 = vector.shape_cast %28 : vector<128xf32> to vector<1x128xf32>
    %cst_23 = arith.constant dense<0.000000e+00> : vector<4x128xf32>
    %30 = tpu.matmul %4, %22, %cst_23 {dimension_numbers = #tpu.dot_dimension_numbers<[1], [0], [0], [1], [0, 0, 1, 1], [], []>} : vector<4x32xf32>, vector<32x128xf32>, vector<4x128xf32> -> vector<4x128xf32>
    %31 = vector.broadcast %29 : vector<1x128xf32> to vector<4x128xf32>
    %32 = arith.addf %30, %31 : vector<4x128xf32>
    %33 = vector.broadcast %8 : f32 to vector<4x128xf32>
    %34 = arith.addf %32, %33 : vector<4x128xf32>
    %35 = vector.extract_strided_slice %22 {offsets = [0, 0], sizes = [8, 128], strides = [1, 1]} : vector<32x128xf32> to vector<8x128xf32>
    %36 = vector.extract_strided_slice %34 {offsets = [0, 0], sizes = [1, 128], strides = [1, 1]} : vector<4x128xf32> to vector<1x128xf32>
    %37 = vector.extract_strided_slice %25 {offsets = [0, 0], sizes = [1, 128], strides = [1, 1]} : vector<4x128xf32> to vector<1x128xf32>
    %38 = vector.extract_strided_slice %22 {offsets = [8, 0], sizes = [8, 128], strides = [1, 1]} : vector<32x128xf32> to vector<8x128xf32>
    %39 = vector.extract_strided_slice %34 {offsets = [1, 0], sizes = [1, 128], strides = [1, 1]} : vector<4x128xf32> to vector<1x128xf32>
    %40 = arith.cmpf ogt, %39, %36 : vector<1x128xf32>
    %41 = arith.select %40, %39, %36 : vector<1x128xi1>, vector<1x128xf32>
    %42 = vector.shape_cast %40 : vector<1x128xi1> to vector<1x128xi1>
    %43 = vector.broadcast %42 : vector<1x128xi1> to vector<8x128xi1>
    %44 = arith.select %43, %38, %35 : vector<8x128xi1>, vector<8x128xf32>
    %45 = vector.extract_strided_slice %25 {offsets = [1, 0], sizes = [1, 128], strides = [1, 1]} : vector<4x128xf32> to vector<1x128xf32>
    %46 = arith.select %40, %45, %37 : vector<1x128xi1>, vector<1x128xf32>
    %47 = vector.extract_strided_slice %22 {offsets = [16, 0], sizes = [8, 128], strides = [1, 1]} : vector<32x128xf32> to vector<8x128xf32>
    %48 = vector.extract_strided_slice %34 {offsets = [2, 0], sizes = [1, 128], strides = [1, 1]} : vector<4x128xf32> to vector<1x128xf32>
    %49 = arith.cmpf ogt, %48, %41 : vector<1x128xf32>
    %50 = arith.select %49, %48, %41 : vector<1x128xi1>, vector<1x128xf32>
    %51 = vector.shape_cast %49 : vector<1x128xi1> to vector<1x128xi1>
    %52 = vector.broadcast %51 : vector<1x128xi1> to vector<8x128xi1>
    %53 = arith.select %52, %47, %44 : vector<8x128xi1>, vector<8x128xf32>
    %54 = vector.extract_strided_slice %25 {offsets = [2, 0], sizes = [1, 128], strides = [1, 1]} : vector<4x128xf32> to vector<1x128xf32>
    %55 = arith.select %49, %54, %46 : vector<1x128xi1>, vector<1x128xf32>
    %56 = vector.extract_strided_slice %22 {offsets = [24, 0], sizes = [8, 128], strides = [1, 1]} : vector<32x128xf32> to vector<8x128xf32>
    %57 = vector.extract_strided_slice %34 {offsets = [3, 0], sizes = [1, 128], strides = [1, 1]} : vector<4x128xf32> to vector<1x128xf32>
    %58 = arith.cmpf ogt, %57, %50 : vector<1x128xf32>
    %59 = vector.shape_cast %58 : vector<1x128xi1> to vector<1x128xi1>
    %60 = vector.broadcast %59 : vector<1x128xi1> to vector<8x128xi1>
    %61 = arith.select %60, %56, %53 : vector<8x128xi1>, vector<8x128xf32>
    %62 = vector.extract_strided_slice %25 {offsets = [3, 0], sizes = [1, 128], strides = [1, 1]} : vector<4x128xf32> to vector<1x128xf32>
    %63 = arith.select %58, %62, %55 : vector<1x128xi1>, vector<1x128xf32>
    %c0_24 = arith.constant 0 : index
    %c0_25 = arith.constant 0 : index
    %c0_26 = arith.constant 0 : index
    %c0_27 = arith.constant 0 : index
    %64 = vector.load %arg11[%c0_24, %c0_25, %c0_26, %c0_27] : memref<1x4x8x128xf32, #tpu.memory_space<vmem>>, vector<1x1x8x128xf32>
    %65 = vector.shape_cast %64 : vector<1x1x8x128xf32> to vector<8x128xf32>
    %66 = vector.shape_cast %61 : vector<8x128xf32> to vector<1x1x8x128xf32>
    tpu.vector_store %arg11[%c0_24, %c0_25, %c0_26, %c0_27], %66 {strides = array<i32>} : memref<1x4x8x128xf32, #tpu.memory_space<vmem>>, vector<1x1x8x128xf32>,
    %c1_i32 = arith.constant 1 : i32
    %c3_i32 = arith.constant 3 : i32
    %67 = arith.addi %c1_i32, %c3_i32 : i32
    %c1_i32_28 = arith.constant 1 : i32
    %68:3 = scf.for %arg12 = %c1_i32 to %67 step %c1_i32_28 iter_args(%arg13 = %61, %arg14 = %14, %arg15 = %63) -> (vector<8x128xf32>, vector<8x128xf32>, vector<1x128xf32>)  : i32 {
      %69 = tpu.concatenate %arg13, %arg14 in 0 : vector<8x128xf32>, vector<8x128xf32> -> vector<16x128xf32>
      %cst_30 = arith.constant dense<0.000000e+00> : vector<2x128xf32>
      %70 = tpu.matmul %6, %69, %cst_30 {dimension_numbers = #tpu.dot_dimension_numbers<[1], [0], [0], [1], [0, 0, 1, 1], [], []>} : vector<2x16xf32>, vector<16x128xf32>, vector<2x128xf32> -> vector<2x128xf32>
      %71 = vector.extract_strided_slice %70 {offsets = [0, 0], sizes = [1, 128], strides = [1, 1]} : vector<2x128xf32> to vector<1x128xf32>
      %72 = vector.broadcast %9 : f32 to vector<1x128xf32>
      %73 = arith.addf %71, %72 : vector<1x128xf32>
      %74 = vector.extract_strided_slice %70 {offsets = [1, 0], sizes = [1, 128], strides = [1, 1]} : vector<2x128xf32> to vector<1x128xf32>
      %75 = vector.broadcast %10 : f32 to vector<1x128xf32>
      %76 = arith.addf %74, %75 : vector<1x128xf32>
      %77 = arith.subf %76, %73 : vector<1x128xf32>
      %78 = math.exp %77 : vector<1x128xf32>
      %cst_31 = arith.constant 1.000000e+00 : f32
      %79 = vector.broadcast %cst_31 : f32 to vector<1x128xf32>
      %80 = arith.addf %79, %78 : vector<1x128xf32>
      %81 = tpu.reciprocal %80 : vector<1x128xf32> -> vector<1x128xf32>
      %cst_32 = arith.constant 1.000000e+00 : f32
      %82 = vector.broadcast %cst_32 : f32 to vector<1x128xf32>
      %83 = arith.subf %82, %81 : vector<1x128xf32>
      %84 = tpu.concatenate %81, %83 in 1 : vector<1x128xf32>, vector<1x128xf32> -> vector<1x256xf32>
      %cst_33 = arith.constant dense<0.000000e+00> : vector<1x256xf32>
      %85 = tpu.matmul %84, %7, %cst_33 {dimension_numbers = #tpu.dot_dimension_numbers<[1], [0], [0], [1], [0, 0, 1, 1], [], []>} : vector<1x256xf32>, vector<256x256xf32>, vector<1x256xf32> -> vector<1x256xf32>
      %86 = vector.extract_strided_slice %85 {offsets = [0, 0], sizes = [1, 128], strides = [1, 1]} : vector<1x256xf32> to vector<1x128xf32>
      %87 = vector.broadcast %86 : vector<1x128xf32> to vector<8x128xf32>
      %88 = arith.mulf %arg13, %87 : vector<8x128xf32>
      %89 = vector.extract_strided_slice %85 {offsets = [0, 128], sizes = [1, 128], strides = [1, 1]} : vector<1x256xf32> to vector<1x128xf32>
      %90 = vector.broadcast %89 : vector<1x128xf32> to vector<8x128xf32>
      %91 = arith.mulf %arg14, %90 : vector<8x128xf32>
      %92 = arith.addf %88, %91 : vector<8x128xf32>
      %93 = vector.broadcast %arg15 : vector<1x128xf32> to vector<128x128xf32>
      %94 = arith.cmpf oeq, %12, %93 : vector<128x128xf32>
      %95 = arith.extui %94 : vector<128x128xi1> to vector<128x128xi32>
      %96 = arith.sitofp %95 : vector<128x128xi32> to vector<128x128xf32>
      %97 = arith.truncf %96 : vector<128x128xf32> to vector<128x128xbf16>
      %cst_34 = arith.constant dense<0.000000e+00> : vector<32x128xf32>
      %98 = tpu.matmul %1, %97, %cst_34 {dimension_numbers = #tpu.dot_dimension_numbers<[1], [0], [0], [1], [0, 0, 1, 1], [], []>} : vector<32x128xbf16>, vector<128x128xbf16>, vector<32x128xf32> -> vector<32x128xf32>
      %99 = arith.extui %94 : vector<128x128xi1> to vector<128x128xi32>
      %100 = arith.sitofp %99 : vector<128x128xi32> to vector<128x128xf32>
      %cst_35 = arith.constant dense<0.000000e+00> : vector<4x128xf32>
      %101 = tpu.matmul %3, %100, %cst_35 {dimension_numbers = #tpu.dot_dimension_numbers<[1], [0], [0], [1], [0, 0, 1, 1], [], []>} : vector<4x128xf32>, vector<128x128xf32>, vector<4x128xf32> -> vector<4x128xf32>
      %102 = vector.broadcast %5 : vector<8x1xf32> to vector<8x128xf32>
      %103 = arith.mulf %92, %102 : vector<8x128xf32>
      %cst_36 = arith.constant dense<0.000000e+00> : vector<128xf32>
      %104 = vector.multi_reduction <add>, %103, %cst_36 [0] : vector<8x128xf32> to vector<128xf32>
      %105 = vector.shape_cast %104 : vector<128xf32> to vector<1x128xf32>
      %cst_37 = arith.constant dense<0.000000e+00> : vector<4x128xf32>
      %106 = tpu.matmul %4, %98, %cst_37 {dimension_numbers = #tpu.dot_dimension_numbers<[1], [0], [0], [1], [0, 0, 1, 1], [], []>} : vector<4x32xf32>, vector<32x128xf32>, vector<4x128xf32> -> vector<4x128xf32>
      %107 = vector.broadcast %105 : vector<1x128xf32> to vector<4x128xf32>
      %108 = arith.addf %106, %107 : vector<4x128xf32>
      %109 = vector.broadcast %8 : f32 to vector<4x128xf32>
      %110 = arith.addf %108, %109 : vector<4x128xf32>
      %111 = arith.subf %arg13, %92 : vector<8x128xf32>
      %112 = arith.mulf %111, %111 : vector<8x128xf32>
      %cst_38 = arith.constant dense<0.000000e+00> : vector<128xf32>
      %113 = vector.multi_reduction <add>, %112, %cst_38 [0] : vector<8x128xf32> to vector<128xf32>
      %114 = vector.shape_cast %113 : vector<128xf32> to vector<1x128xf32>
      %115 = vector.extract_strided_slice %98 {offsets = [0, 0], sizes = [8, 128], strides = [1, 1]} : vector<32x128xf32> to vector<8x128xf32>
      %116 = vector.extract_strided_slice %110 {offsets = [0, 0], sizes = [1, 128], strides = [1, 1]} : vector<4x128xf32> to vector<1x128xf32>
      %117 = arith.subf %115, %arg13 : vector<8x128xf32>
      %118 = arith.mulf %117, %111 : vector<8x128xf32>
      %cst_39 = arith.constant dense<0.000000e+00> : vector<128xf32>
      %119 = vector.multi_reduction <add>, %118, %cst_39 [0] : vector<8x128xf32> to vector<128xf32>
      %120 = vector.shape_cast %119 : vector<128xf32> to vector<1x128xf32>
      %121 = arith.mulf %117, %117 : vector<8x128xf32>
      %cst_40 = arith.constant dense<0.000000e+00> : vector<128xf32>
      %122 = vector.multi_reduction <add>, %121, %cst_40 [0] : vector<8x128xf32> to vector<128xf32>
      %123 = vector.shape_cast %122 : vector<128xf32> to vector<1x128xf32>
      %124 = arith.mulf %114, %123 : vector<1x128xf32>
      %cst_41 = arith.constant 1.000000e-16 : f32
      %125 = vector.broadcast %cst_41 : f32 to vector<1x128xf32>
      %126 = arith.maximumf %124, %125 : vector<1x128xf32>
      %127 = math.rsqrt %126 : vector<1x128xf32>
      %128 = arith.mulf %120, %127 : vector<1x128xf32>
      %cst_42 = arith.constant 1.000000e+00 : f32
      %129 = vector.broadcast %cst_42 : f32 to vector<1x128xf32>
      %130 = arith.addf %129, %128 : vector<1x128xf32>
      %cst_43 = arith.constant 0.000000e+00 : f32
      %cst_44 = arith.constant 1.000000e+00 : f32
      %131 = vector.broadcast %cst_43 : f32 to vector<1x128xf32>
      %132 = arith.maximumf %131, %130 : vector<1x128xf32>
      %133 = vector.broadcast %cst_44 : f32 to vector<1x128xf32>
      %134 = arith.minimumf %133, %132 : vector<1x128xf32>
      %135 = arith.mulf %116, %134 : vector<1x128xf32>
      %136 = vector.extract_strided_slice %101 {offsets = [0, 0], sizes = [1, 128], strides = [1, 1]} : vector<4x128xf32> to vector<1x128xf32>
      %137 = vector.extract_strided_slice %98 {offsets = [8, 0], sizes = [8, 128], strides = [1, 1]} : vector<32x128xf32> to vector<8x128xf32>
      %138 = vector.extract_strided_slice %110 {offsets = [1, 0], sizes = [1, 128], strides = [1, 1]} : vector<4x128xf32> to vector<1x128xf32>
      %139 = arith.subf %137, %arg13 : vector<8x128xf32>
      %140 = arith.mulf %139, %111 : vector<8x128xf32>
      %cst_45 = arith.constant dense<0.000000e+00> : vector<128xf32>
      %141 = vector.multi_reduction <add>, %140, %cst_45 [0] : vector<8x128xf32> to vector<128xf32>
      %142 = vector.shape_cast %141 : vector<128xf32> to vector<1x128xf32>
      %143 = arith.mulf %139, %139 : vector<8x128xf32>
      %cst_46 = arith.constant dense<0.000000e+00> : vector<128xf32>
      %144 = vector.multi_reduction <add>, %143, %cst_46 [0] : vector<8x128xf32> to vector<128xf32>
      %145 = vector.shape_cast %144 : vector<128xf32> to vector<1x128xf32>
      %146 = arith.mulf %114, %145 : vector<1x128xf32>
      %cst_47 = arith.constant 1.000000e-16 : f32
      %147 = vector.broadcast %cst_47 : f32 to vector<1x128xf32>
      %148 = arith.maximumf %146, %147 : vector<1x128xf32>
      %149 = math.rsqrt %148 : vector<1x128xf32>
      %150 = arith.mulf %142, %149 : vector<1x128xf32>
      %cst_48 = arith.constant 1.000000e+00 : f32
      %151 = vector.broadcast %cst_48 : f32 to vector<1x128xf32>
      %152 = arith.addf %151, %150 : vector<1x128xf32>
      %cst_49 = arith.constant 0.000000e+00 : f32
      %cst_50 = arith.constant 1.000000e+00 : f32
      %153 = vector.broadcast %cst_49 : f32 to vector<1x128xf32>
      %154 = arith.maximumf %153, %152 : vector<1x128xf32>
      %155 = vector.broadcast %cst_50 : f32 to vector<1x128xf32>
      %156 = arith.minimumf %155, %154 : vector<1x128xf32>
      %157 = arith.mulf %138, %156 : vector<1x128xf32>
      %158 = arith.cmpf ogt, %157, %135 : vector<1x128xf32>
      %159 = arith.select %158, %157, %135 : vector<1x128xi1>, vector<1x128xf32>
      %160 = vector.shape_cast %158 : vector<1x128xi1> to vector<1x128xi1>
      %161 = vector.broadcast %160 : vector<1x128xi1> to vector<8x128xi1>
      %162 = arith.select %161, %137, %115 : vector<8x128xi1>, vector<8x128xf32>
      %163 = vector.extract_strided_slice %101 {offsets = [1, 0], sizes = [1, 128], strides = [1, 1]} : vector<4x128xf32> to vector<1x128xf32>
      %164 = arith.select %158, %163, %136 : vector<1x128xi1>, vector<1x128xf32>
      %165 = vector.extract_strided_slice %98 {offsets = [16, 0], sizes = [8, 128], strides = [1, 1]} : vector<32x128xf32> to vector<8x128xf32>
      %166 = vector.extract_strided_slice %110 {offsets = [2, 0], sizes = [1, 128], strides = [1, 1]} : vector<4x128xf32> to vector<1x128xf32>
      %167 = arith.subf %165, %arg13 : vector<8x128xf32>
      %168 = arith.mulf %167, %111 : vector<8x128xf32>
      %cst_51 = arith.constant dense<0.000000e+00> : vector<128xf32>
      %169 = vector.multi_reduction <add>, %168, %cst_51 [0] : vector<8x128xf32> to vector<128xf32>
      %170 = vector.shape_cast %169 : vector<128xf32> to vector<1x128xf32>
      %171 = arith.mulf %167, %167 : vector<8x128xf32>
      %cst_52 = arith.constant dense<0.000000e+00> : vector<128xf32>
      %172 = vector.multi_reduction <add>, %171, %cst_52 [0] : vector<8x128xf32> to vector<128xf32>
      %173 = vector.shape_cast %172 : vector<128xf32> to vector<1x128xf32>
      %174 = arith.mulf %114, %173 : vector<1x128xf32>
      %cst_53 = arith.constant 1.000000e-16 : f32
      %175 = vector.broadcast %cst_53 : f32 to vector<1x128xf32>
      %176 = arith.maximumf %174, %175 : vector<1x128xf32>
      %177 = math.rsqrt %176 : vector<1x128xf32>
      %178 = arith.mulf %170, %177 : vector<1x128xf32>
      %cst_54 = arith.constant 1.000000e+00 : f32
      %179 = vector.broadcast %cst_54 : f32 to vector<1x128xf32>
      %180 = arith.addf %179, %178 : vector<1x128xf32>
      %cst_55 = arith.constant 0.000000e+00 : f32
      %cst_56 = arith.constant 1.000000e+00 : f32
      %181 = vector.broadcast %cst_55 : f32 to vector<1x128xf32>
      %182 = arith.maximumf %181, %180 : vector<1x128xf32>
      %183 = vector.broadcast %cst_56 : f32 to vector<1x128xf32>
      %184 = arith.minimumf %183, %182 : vector<1x128xf32>
      %185 = arith.mulf %166, %184 : vector<1x128xf32>
      %186 = arith.cmpf ogt, %185, %159 : vector<1x128xf32>
      %187 = arith.select %186, %185, %159 : vector<1x128xi1>, vector<1x128xf32>
      %188 = vector.shape_cast %186 : vector<1x128xi1> to vector<1x128xi1>
      %189 = vector.broadcast %188 : vector<1x128xi1> to vector<8x128xi1>
      %190 = arith.select %189, %165, %162 : vector<8x128xi1>, vector<8x128xf32>
      %191 = vector.extract_strided_slice %101 {offsets = [2, 0], sizes = [1, 128], strides = [1, 1]} : vector<4x128xf32> to vector<1x128xf32>
      %192 = arith.select %186, %191, %164 : vector<1x128xi1>, vector<1x128xf32>
      %193 = vector.extract_strided_slice %98 {offsets = [24, 0], sizes = [8, 128], strides = [1, 1]} : vector<32x128xf32> to vector<8x128xf32>
      %194 = vector.extract_strided_slice %110 {offsets = [3, 0], sizes = [1, 128], strides = [1, 1]} : vector<4x128xf32> to vector<1x128xf32>
      %195 = arith.subf %193, %arg13 : vector<8x128xf32>
      %196 = arith.mulf %195, %111 : vector<8x128xf32>
      %cst_57 = arith.constant dense<0.000000e+00> : vector<128xf32>
      %197 = vector.multi_reduction <add>, %196, %cst_57 [0] : vector<8x128xf32> to vector<128xf32>
      %198 = vector.shape_cast %197 : vector<128xf32> to vector<1x128xf32>
      %199 = arith.mulf %195, %195 : vector<8x128xf32>
      %cst_58 = arith.constant dense<0.000000e+00> : vector<128xf32>
      %200 = vector.multi_reduction <add>, %199, %cst_58 [0] : vector<8x128xf32> to vector<128xf32>
      %201 = vector.shape_cast %200 : vector<128xf32> to vector<1x128xf32>
      %202 = arith.mulf %114, %201 : vector<1x128xf32>
      %cst_59 = arith.constant 1.000000e-16 : f32
      %203 = vector.broadcast %cst_59 : f32 to vector<1x128xf32>
      %204 = arith.maximumf %202, %203 : vector<1x128xf32>
      %205 = math.rsqrt %204 : vector<1x128xf32>
      %206 = arith.mulf %198, %205 : vector<1x128xf32>
      %cst_60 = arith.constant 1.000000e+00 : f32
      %207 = vector.broadcast %cst_60 : f32 to vector<1x128xf32>
      %208 = arith.addf %207, %206 : vector<1x128xf32>
      %cst_61 = arith.constant 0.000000e+00 : f32
      %cst_62 = arith.constant 1.000000e+00 : f32
      %209 = vector.broadcast %cst_61 : f32 to vector<1x128xf32>
      %210 = arith.maximumf %209, %208 : vector<1x128xf32>
      %211 = vector.broadcast %cst_62 : f32 to vector<1x128xf32>
      %212 = arith.minimumf %211, %210 : vector<1x128xf32>
      %213 = arith.mulf %194, %212 : vector<1x128xf32>
      %214 = arith.cmpf ogt, %213, %187 : vector<1x128xf32>
      %215 = vector.shape_cast %214 : vector<1x128xi1> to vector<1x128xi1>
      %216 = vector.broadcast %215 : vector<1x128xi1> to vector<8x128xi1>
      %217 = arith.select %216, %193, %190 : vector<8x128xi1>, vector<8x128xf32>
      %218 = vector.extract_strided_slice %101 {offsets = [3, 0], sizes = [1, 128], strides = [1, 1]} : vector<4x128xf32> to vector<1x128xf32>
      %219 = arith.select %214, %218, %192 : vector<1x128xi1>, vector<1x128xf32>
      %220 = vector.shape_cast %217 : vector<8x128xf32> to vector<1x8x128xf32>
      %c0_63 = arith.constant 0 : index
      %221 = arith.index_cast %arg12 : i32 to index
      %c0_64 = arith.constant 0 : index
      %c0_65 = arith.constant 0 : index
      %222 = vector.load %arg11[%c0_63, %221, %c0_64, %c0_65] : memref<1x4x8x128xf32, #tpu.memory_space<vmem>>, vector<1x1x8x128xf32>
      %223 = vector.shape_cast %222 : vector<1x1x8x128xf32> to vector<1x8x128xf32>
      %224 = vector.shape_cast %220 : vector<1x8x128xf32> to vector<1x1x8x128xf32>
      tpu.vector_store %arg11[%c0_63, %221, %c0_64, %c0_65], %224 {strides = array<i32>} : memref<1x4x8x128xf32, #tpu.memory_space<vmem>>, vector<1x1x8x128xf32>,
      scf.yield %217, %92, %219 : vector<8x128xf32>, vector<8x128xf32>, vector<1x128xf32>
    }
    %c3_i32_29 = arith.constant 3 : i32
    return
  }
  func.func @transform_0(%arg0: i32) -> (i32, i32, i32) {
    %c0_i32 = arith.constant 0 : i32
    %c0_i32_0 = arith.constant 0 : i32
    %c0_i32_1 = arith.constant 0 : i32
    return %arg0, %c0_i32, %c0_i32_0 : i32, i32, i32
  }
  func.func @transform_1(%arg0: i32) -> (i32, i32, i32) {
    %c0_i32 = arith.constant 0 : i32
    %c0_i32_0 = arith.constant 0 : i32
    %c0_i32_1 = arith.constant 0 : i32
    return %arg0, %c0_i32, %c0_i32_0 : i32, i32, i32
  }
  func.func @transform_2(%arg0: i32) -> (i32, i32, i32) {
    %c0_i32 = arith.constant 0 : i32
    %c0_i32_0 = arith.constant 0 : i32
    %c0_i32_1 = arith.constant 0 : i32
    return %arg0, %c0_i32, %c0_i32_0 : i32, i32, i32
  }
  func.func @transform_3(%arg0: i32) -> (i32, i32, i32) {
    %c0_i32 = arith.constant 0 : i32
    %c0_i32_0 = arith.constant 0 : i32
    %c0_i32_1 = arith.constant 0 : i32
    return %arg0, %c0_i32, %c0_i32_0 : i32, i32, i32
  }
  func.func @transform_4(%arg0: i32) -> (i32, i32) {
    %c0_i32 = arith.constant 0 : i32
    %c0_i32_0 = arith.constant 0 : i32
    %c0_i32_1 = arith.constant 0 : i32
    return %c0_i32, %c0_i32_0 : i32, i32
  }
  func.func @transform_5(%arg0: i32) -> (i32, i32) {
    %c0_i32 = arith.constant 0 : i32
    %c0_i32_0 = arith.constant 0 : i32
    %c0_i32_1 = arith.constant 0 : i32
    return %c0_i32, %c0_i32_0 : i32, i32
  }
  func.func @transform_6(%arg0: i32) -> (i32, i32) {
    %c0_i32 = arith.constant 0 : i32
    %c0_i32_0 = arith.constant 0 : i32
    %c0_i32_1 = arith.constant 0 : i32
    return %c0_i32, %c0_i32_0 : i32, i32
  }
  func.func @transform_7(%arg0: i32) -> (i32, i32) {
    %c0_i32 = arith.constant 0 : i32
    %c0_i32_0 = arith.constant 0 : i32
    %c0_i32_1 = arith.constant 0 : i32
    return %c0_i32, %c0_i32_0 : i32, i32
  }
  func.func @transform_8(%arg0: i32) -> i32 {
    %c0_i32 = arith.constant 0 : i32
    %c0_i32_0 = arith.constant 0 : i32
    return %c0_i32 : i32
  }
  func.func @transform_9(%arg0: i32) -> i32 {
    %c0_i32 = arith.constant 0 : i32
    %c0_i32_0 = arith.constant 0 : i32
    return %c0_i32 : i32
  }
  func.func @transform_10(%arg0: i32) -> (i32, i32, i32, i32) {
    %c0_i32 = arith.constant 0 : i32
    %c0_i32_0 = arith.constant 0 : i32
    %c0_i32_1 = arith.constant 0 : i32
    %c0_i32_2 = arith.constant 0 : i32
    return %arg0, %c0_i32, %c0_i32_0, %c0_i32_1 : i32, i32, i32, i32
  }
}

</mosaic_0001>

<bundles_post_ra>
// kernel: tpu_custom_call.1
= control target key start
LH: loop header
LB: loop body
LE: loop exit
PB: predicated region body
PF: predicated region fallthrough
CT: control target
= control target key end

     0   :  { %s3621_s0 = inlined_call_operand.hbm [shape: bf16[2,32,128], index: 0, kind: input, shape index: {}]   ;;  %s3622_s1 = inlined_call_operand.vmem [shape: f32[2,4,128], index: 1, kind: input, shape index: {}]   ;;  %s3623_s2 = inlined_call_operand.hbm [shape: f32[2,1,128], index: 2, kind: input, shape index: {}]   ;;  %s3624_s3 = inlined_call_operand.vmem [shape: f32[2,8,128], index: 3, kind: input, shape index: {}]   ;;  %s3625_s4 = inlined_call_operand.hbm [shape: f32[4,32], index: 4, kind: input, shape index: {}]   ;;  %s3626_s5 = inlined_call_operand.vmem [shape: f32[8,1], index: 5, kind: input, shape index: {}]   ;;  %s3627_s6 = inlined_call_operand.vmem [shape: f32[2,16], index: 6, kind: input, shape index: {}]   ;;  %s3628_s7 = inlined_call_operand.hbm [shape: f32[256,256], index: 7, kind: input, shape index: {}]   ;;  %s3629_s8 = inlined_call_operand.<no memory space> [shape: f32[1], index: 8, kind: input, shape index: {}]   ;;  %s3630_s9 = inlined_call_operand.vmem [shape: f32[2], index: 9, kind: input, shape index: {}]   ;;  %s3631_s10 = inlined_call_operand.hbm [shape: f32[2,4,8,128], index: 10, kind: output, shape index: {}]  }
   0x1   :  { %3659 = sst [smem:[#allocation92_spill]] %s3621_s0 }
   0x2   :  { %3660 = sst [smem:[#allocation93_spill]] %s3625_s4 }
   0x3   :  { %3661 = sst [smem:[#allocation94_spill]] %s3628_s7 }
   0x4   :  { %3662 = sst [smem:[#allocation95_spill]] %s3630_s9 }
   0x5   :  { %15 = sst [smem:[#allocation2]] %s3629_s8 }
   0x6   :  { %16 = vsyncpa [#allocation4], 0 }
   0x7   :  { %18 = vsyncpa [#allocation4 + $0x1], 0 }
   0x8   :  { %19 = vsyncpa [#allocation8], 0 }
   0x9   :  { %21 = vsyncpa [#allocation8 + $0x1], 0 }
   0xa   :  { %22 = vsyncpa [#allocation11], 0 }
   0xb   :  { %23 = vsyncpa [#allocation6], 0 }
   0xc   :  { %24 = vsyncpa [#allocation5], 0 }
   0xd   :  { %26 = vsyncpa [#allocation5 + $0x1], 0  ;;  %s2631_s15 = smov 0   ;;  %s2633_s16 = smov 0  }
   0xe   :  { %s2635_s17 = smov 0   ;;  %s2637_s18 = smov 0  }
   0xf LB: > { %3663 = sst [smem:[#allocation20_spill]] %s2529_s17  ;;  %s2652_s8 = sadd.s32 4294967295, %s2533_s18   ;;  %s2533_s18 = sphi %s2637_s18, %s3890_s18   ;;  %s2529_s17 = sphi %s2635_s17, %s3887_s17   ;;  %s2525_s16 = sphi %s2633_s16, %s3889_s16   ;;  %s2521_s15 = sphi %s2631_s15, %s3888_s15  }
  0x10   : > { %s1697_s19 = sadd.s32 4294967294, %s2533_s18   ;;  %p52_p0 = scmp.ne.s32.totalorder %s2525_s16, %s2521_s15 }
  0x11   : > { %p3632_p1 = scmp.eq.s32.totalorder %s2652_s8, 0  ;;  %p286_p3 = scmp.eq.s32.totalorder %s1697_s19, 1 }
  0x12   : > { %p1698_p5 = scmp.ge.s32.totalorder %s2533_s18, 1  ;;  %p293_p7 = scmp.lt.s32.totalorder %s2533_s18, 3 }
  0x13   : > { %p2661_p4 = por %p3632_p1, %p52_p0  ;;  %p2666_p6 = por %p286_p3, %p52_p0 }
  0x14   : > { %p2671_p8 = pnand %p1698_p5, %p293_p7  ;;  %s2551_s23 = smov [#allocation9]  }
  0x15   : > { %s3664_s20 = scalar_select %p2661_p4, 1, 0 }
  0x16   : > { %s3665_s21 = scalar_select %p2666_p6, 1, 0 }
  0x17   : > { %s3666_s22 = scalar_select %p2671_p8, 1, 0 }
  0x18   : > { %s306_s24 = sshll.u32 %s2551_s23, 4  ;;  %p2177_p10 = pneg %p2671_p8  ;;  %s307_s24 = int_to_ptr.vmem [resolvable:$true] %s306_s24 }
  0x19   : > { %s2552_s25 = smov [#allocation10]   ;;  %s3668_s9 = sld [smem:[#allocation95_spill]] }
  0x1a   : > { %s322_s26 = sshll.u32 %s2552_s25, 4  ;;  %p2680_p11 = pnand %p2177_p10, %p3632_p1  ;;  %s2684_s26 = int_to_ptr.vmem [resolvable:$true] %s322_s26 }
  0x1b   : > { %s3669_s4 = sld [smem:[#allocation93_spill]] }
  0x1c   : > { %p2699_p13 = pneg %p2680_p11 }
  0x1f   : > { %s339_s30 = sshll.u32 %s3668_s9, 4  ;;  %s2689_s30 = int_to_ptr.vmem [resolvable:$true] %s339_s30 }
  0x21   : > { %s2304_s13 = scalar_lea.hbm %s3669_s4, 64 }
  0x22   : > { %p2305_p12 = scmp.ne.s32.totalorder %s3669_s4, %s2304_s13  ;;  %p2311_p5 = scmp.lt.u32.totalorder %s2304_s13, %s3669_s4 }
  0x24   : > { %p2307_p0 = pnand %p2699_p13, %p2305_p12 }
  0x26   : > { %p2308_p3 = pneg %p2307_p0 }
  0x28   : > { %p2313_p7 = pnand %p2311_p5, %p2308_p3 }
  0x2a   : > { %2316 = shalt.err (!%p2313_p7)
}
  0x2b   : > { %s2317_s29 = scalar_lea.vmem %s307_s24, 64  ;;  %p2325_p2 = scmp.lt.s32.totalorder %s307_s24, %s307_s24 }
  0x2c   : > { %p2318_p10 = scmp.ne.s32.totalorder %s307_s24, %s2317_s29  ;;  %p2326_p6 = scmp.lt.s32.totalorder %s2317_s29, %s2317_s29 }
  0x2e   : > { %p2320_p9 = pnand %p2318_p10, %p2699_p13  ;;  %p2327_p4 = por %p2326_p6, %p2325_p2 }
  0x30   : > { %p2321_p1 = pneg %p2320_p9 }
  0x32   : > { %p2328_p8 = pnand %p2327_p4, %p2321_p1 }
  0x34   : > { %2331 = shalt.err (!%p2328_p8)
}
  0x35   : > { %2180 = dma.hbm_to_vmem [thread:$0]  (!%p2680_p11), %s3669_s4, 64, %s307_s24, [#allocation8]  }
  0x36   : > { %s3671_s7 = sld [smem:[#allocation94_spill]] }
  0x3c   : > { %s2332_s19 = scalar_lea.hbm %s3671_s7, 8192 }
  0x3d   : > { %p2333_p9 = scmp.ne.s32.totalorder %s3671_s7, %s2332_s19  ;;  %p2339_p1 = scmp.lt.u32.totalorder %s2332_s19, %s3671_s7 }
  0x3f   : > { %p2335_p12 = pnand %p2333_p9, %p2699_p13 }
  0x41   : > { %p2336_p2 = pneg %p2335_p12 }
  0x43   : > { %p2341_p4 = pnand %p2339_p1, %p2336_p2 }
  0x45   : > { %2344 = shalt.err (!%p2341_p4)
}
  0x46   : > { %s2345_s24 = scalar_lea.vmem %s2684_s26, 8192  ;;  %p2353_p3 = scmp.lt.s32.totalorder %s2684_s26, %s2684_s26 }
  0x47   : > { %p2346_p6 = scmp.ne.s32.totalorder %s2684_s26, %s2345_s24  ;;  %p2354_p5 = scmp.lt.s32.totalorder %s2345_s24, %s2345_s24 }
  0x49   : > { %p2348_p8 = pnand %p2346_p6, %p2699_p13  ;;  %p2355_p7 = por %p2354_p5, %p2353_p3 }
  0x4b   : > { %p2349_p0 = pneg %p2348_p8 }
  0x4d   : > { %p2356_p10 = pnand %p2355_p7, %p2349_p0 }
  0x4f   : > { %2359 = shalt.err (!%p2356_p10)
}
  0x50   : > { %s2553_s11 = smov 256   ;;  %s2554_s9 = smov 16  }
  0x51   : > { %2183 = dma.hbm_to_vmem [thread:$0]  (!%p2680_p11), %s3671_s7, 8192, %s2684_s26, [#allocation11], %s2553_s11, %s2553_s11, %s2554_s9  }
  0x52   : > { %s2360_s14 = scalar_lea.vmem %s2689_s30, 16  ;;  %p2368_p1 = scmp.lt.s32.totalorder %s2689_s30, %s2689_s30 }
  0x53   : > { %p2361_p9 = scmp.ne.s32.totalorder %s2689_s30, %s2360_s14  ;;  %p2369_p4 = scmp.lt.s32.totalorder %s2360_s14, %s2360_s14 }
  0x55   : > { %p2363_p12 = pnand %p2361_p9, %p2699_p13  ;;  %p2370_p6 = por %p2369_p4, %p2368_p1 }
  0x57   : > { %p2364_p2 = pneg %p2363_p12 }
  0x59   : > { %p2371_p8 = pnand %p2370_p6, %p2364_p2 }
  0x5b   : > { %2374 = shalt.err (!%p2371_p8)
}
  0x5c   : > { %s2555_s19 = smov [#allocation12]   ;;  %s2748_s26 = sadd.s32 1, %s2533_s18  }
  0x5d   : > { %2186 = dma.vmem_to_smem (!%p2680_p11), %s2689_s30, 16, %s2555_s19, [#allocation6]  }
  0x5e   : > { %s36_s23 = ssub.s32 %s2533_s18, %s2748_s26  ;;  %s39_s25 = sadd.s32 1, %s2529_s17 }
  0x5f   : > { %p37_p13 = scmp.eq.s32.totalorder %s36_s23, 0  ;;  %p46_p0 = scmp.ne.s32.totalorder %s2529_s17, %s2525_s16 }
  0x60   : > { %p47_p3 = scmp.eq.s32.totalorder %s2533_s18, 0  ;;  %p2201_p5 = scmp.lt.s32.totalorder %s2533_s18, 2 }
  0x61   : > { %s2758_s27 = scalar_select %p37_p13, %s2529_s17, %s39_s25  }
  0x62   : > { %p48_p7 = por %p47_p3, %p46_p0  ;;  %p3673_p10 = scmp.eq.s32.totalorder %s2652_s8, 1 }
  0x63   : > { %3672 = sst [smem:[#allocation21_spill]] %s2758_s27  ;;  %s2767_s29 = sand.u32 1, %s2529_s17  }
  0x64   : > { %p2762_p9 = por %p3673_p10, %p46_p0  ;;  %s1824_s30 = sshll.u32 %s2533_s18, 8 }
  0x65   : > { %s1703_s24 = sshll.u32 %s2767_s29, 4  ;;  %s3675_s0 = sld [smem:[#allocation92_spill]] }
  0x66   : > { %s3674_s28 = scalar_select %p2762_p9, 1, 0 }
  0x67   : > { %s354_s13 = scalar_lea.vmem [#allocation3], %s1703_s24  ;;  %p2776_p11 = pnand %p2201_p5, %p48_p7 }
  0x68   : > { %s361_s14 = sshll.u32 %s354_s13, 4  ;;  %s2780_s14 = int_to_ptr.vmem [resolvable:$true] %s361_s14 }
  0x69   : > { %p2377_p2 = pneg %p2776_p11 }
  0x6b   : > { %s2774_s12 = scalar_lea.hbm %s3675_s0, %s1824_s30  ;;  %s2380_s11 = scalar_lea.hbm %s3675_s0, 512 }
  0x6c   : > { %s2375_s25 = scalar_lea.hbm %s2774_s12, 256  ;;  %p2381_p6 = scmp.lt.u32.totalorder %s2774_s12, %s3675_s0 }
  0x6d   : > { %p2376_p12 = scmp.ne.s32.totalorder %s2774_s12, %s2375_s25  ;;  %p2382_p8 = scmp.lt.u32.totalorder %s2380_s11, %s2375_s25 }
  0x6e   : > { %p2384_p0 = scmp.lt.u32.totalorder %s2375_s25, %s2774_s12 }
  0x6f   : > { %p2378_p1 = pnand %p2377_p2, %p2376_p12  ;;  %p2383_p13 = por %p2382_p8, %p2381_p6 }
  0x71   : > { %p2379_p4 = pneg %p2378_p1  ;;  %p2385_p3 = por %p2384_p0, %p2383_p13 }
  0x73   : > { %p2386_p5 = pnand %p2385_p3, %p2379_p4 }
  0x75   : > { %2389 = shalt.err (!%p2386_p5)
}
  0x76   : > { %s2390_s23 = scalar_lea.vmem %s2780_s14, 256  ;;  %s2556_s30 = smov [#allocation3]  }
  0x77   : > { %p2391_p7 = scmp.ne.s32.totalorder %s2780_s14, %s2390_s23  ;;  %s2395_s24 = sshll.u32 %s2556_s30, 4  ;;  %s2396_s24 = int_to_ptr.vmem [resolvable:$false] %s2395_s24 }
  0x78   : > { %s2397_s9 = scalar_lea.vmem %s2396_s24, 512  ;;  %p2398_p1 = scmp.lt.s32.totalorder %s2780_s14, %s2396_s24 }
  0x79   : > { %p2393_p10 = pnand %p2391_p7, %p2377_p2  ;;  %p2399_p6 = scmp.lt.s32.totalorder %s2397_s9, %s2390_s23 }
  0x7b   : > { %p2394_p12 = pneg %p2393_p10  ;;  %p2400_p8 = por %p2399_p6, %p2398_p1 }
  0x7d   : > { %p2401_p13 = pnand %p2400_p8, %p2394_p12 }
  0x7f   : > { %2404 = shalt.err (!%p2401_p13)
}
  0x80   : > { %s2557_s25 = smov 64   ;;  %s2558_s11 = smov 4  }
  0x81   : > { %s3677_s13 = scalar_lea.sflag [#allocation4], %s2767_s29  ;;  %s378_s30 = sand.u32 1, %s2533_s18  }
  0x82   : > { %2190 = dma.hbm_to_vmem [thread:$0]  (!%p2776_p11), %s2774_s12, 256, %s2780_s14, %s3677_s13, %s2557_s25, %s2557_s25, %s2558_s11  }
  0x83   : > { %s1706_s0 = sshll.u32 %s2533_s18, 4  ;;  %s381_s4 = scalar_lea.vmem [#allocation7], %s2767_s29 }
  0x84   : > { %s2815_s9 = scalar_lea.hbm %s3623_s2, %s1706_s0  ;;  %s388_s7 = sshll.u32 %s381_s4, 4  ;;  %s389_s7 = int_to_ptr.vmem [resolvable:$true] %s388_s7 }
  0x85   : > { %s379_s27 = scalar_lea.sflag [#allocation8], %s378_s30  ;;  %s2405_s17 = scalar_lea.hbm %s2815_s9, 16 }
  0x86   : > { %p2406_p4 = scmp.ne.s32.totalorder %s2815_s9, %s2405_s17  ;;  %s2410_s25 = scalar_lea.hbm %s3623_s2, 32 }
  0x87   : > { %p2411_p5 = scmp.lt.u32.totalorder %s2815_s9, %s3623_s2  ;;  %p2412_p7 = scmp.lt.u32.totalorder %s2410_s25, %s2405_s17 }
  0x88   : > { %p2408_p0 = pnand %p2406_p4, %p2377_p2  ;;  %p2414_p12 = scmp.lt.u32.totalorder %s2405_s17, %s2815_s9 }
  0x89   : > { %p2413_p10 = por %p2412_p7, %p2411_p5 }
  0x8a   : > { %p2409_p3 = pneg %p2408_p0 }
  0x8b   : > { %p2415_p1 = por %p2414_p12, %p2413_p10 }
  0x8d   : > { %p2416_p6 = pnand %p2415_p1, %p2409_p3 }
  0x8f   : > { %2419 = shalt.err (!%p2416_p6)
}
  0x90   : > { %s2420_s4 = scalar_lea.vmem %s389_s7, 16  ;;  %s2559_s29 = smov [#allocation7]  }
  0x91   : > { %p2421_p8 = scmp.ne.s32.totalorder %s389_s7, %s2420_s4  ;;  %s2425_s13 = sshll.u32 %s2559_s29, 4  ;;  %s2426_s13 = int_to_ptr.vmem [resolvable:$false] %s2425_s13 }
  0x92   : > { %s2427_s30 = scalar_lea.vmem %s2426_s13, 32  ;;  %p2428_p0 = scmp.lt.s32.totalorder %s389_s7, %s2426_s13 }
  0x93   : > { %p2423_p13 = pnand %p2421_p8, %p2377_p2  ;;  %p2429_p9 = scmp.lt.s32.totalorder %s2427_s30, %s2420_s4 }
  0x95   : > { %p2424_p4 = pneg %p2423_p13  ;;  %p2430_p5 = por %p2429_p9, %p2428_p0 }
  0x97   : > { %p2431_p7 = pnand %p2430_p5, %p2424_p4 }
  0x99   : > { %2434 = shalt.err (!%p2431_p7)
}
  0x9a   : > { %2193 = dma.hbm_to_vmem [thread:$0]  (!%p2776_p11), %s2815_s9, 16, %s389_s7, %s379_s27  }
  0x9b   : > { %p3678_p3 = scmp.ne.s32.totalorder %s3666_s22, 0 }
  0x9d   : > { %404 = sbr.rel (%p3678_p3) target bundleno = 1253 (0x4e5), region = 60 }
  0xa4   : > { %s2840_s17 = sand.u32 1, %s2525_s16   ;;  %p3679_p9 = scmp.ne.s32.totalorder %s3664_s20, 0 }
  0xa5   : > { %s1708_s24 = sshll.u32 %s2840_s17, 4  ;;  %s407_s23 = scalar_lea.sflag [#allocation4], %s2840_s17 }
  0xa6   : > { %s2844_s12 = scalar_lea.vmem [#allocation3], %s1708_s24 }
  0xa7   : > { %2496 = dma.done.wait (%p3679_p9), %s407_s23, 256  }
  0xa8   : > { %2498 = vsyncadd (%p3679_p9), %s407_s23, 4294967040  ;;  %s415_s7 = sand.u32 1, %s2652_s8   ;;  %s418_s27 = scalar_lea.vmem [#allocation7], %s2840_s17 }
  0xa9   : > { %s416_s22 = scalar_lea.sflag [#allocation8], %s415_s7 }
  0xaa   : > { %2500 = dma.done.wait (%p3679_p9), %s416_s22, 16  }
  0xab   : > { %2502 = vsyncadd (%p3679_p9), %s416_s22, 4294967280  ;;  %p3680_p11 = scmp.eq.s32.totalorder %s2652_s8, 0 }
  0xad   : > { %2504 = dma.done.wait (%p3680_p11), [#allocation8], 64   ;;  %p3681_p2 = pmov %p3680_p11 }
  0xaf   : > { %2506 = vsyncadd (%p3681_p2), [#allocation8], 4294967232  ;;  %p3682_p10 = pmov %p3681_p2 }
  0xb0   : > { %p3683_p12 = pmov %p3681_p2 }
  0xb1   : > { %2508 = dma.done.wait (%p3682_p10), [#allocation11], 8192  }
  0xb2   : > { %2510 = vsyncadd (%p3683_p12), [#allocation11], 4294959104  ;;  %p3684_p1 = pmov %p3681_p2 }
  0xb4   : > { %2512 = dma.done.wait (%p3684_p1), [#allocation6], 16   ;;  %p3685_p6 = pmov %p3684_p1 }
  0xb6   : > { %2514 = vsyncadd (%p3685_p6), [#allocation6], 4294967280 }
  0xb7   : > { %435 = sfence }
  0xb8   : > { %v2871_v0 = vld [vmem:[%s3627_s6] sm:$0x3]  ;;  %v2873_v1 = vld [vmem:[#allocation10] sm:$0xff]  ;;  %v2875_v2 = vld [vmem:[#allocation10 + $0x8] sm:$0xff]  ;;  %s2877_s9 = sld [smem:[#allocation12]]  ;;  %s2885_s14 = sld [smem:[#allocation12 + $0x1]]  ;;  %v564_v22 = vlaneseq }
  0xb9   : > { %3686 = vst [vmem:[#allocation22_spill] sm:$0xff] %v2871_v0  ;;  %3687 = vst [vmem:[#allocation23_spill] sm:$0xff] %v2873_v1  ;;  %v2879_v3 = vld [vmem:[#allocation10 + $0x10] sm:$0xff]  ;;  %v2881_v4 = vld [vmem:[#allocation10 + $0x18] sm:$0xff]  ;;  %v3637_v9 = vmov 0.0|0.0   ;;  %p480_p8 = scmp.lt.s32.totalorder %s2652_s8, 1 }
  0xba   : > { %3688 = vst [vmem:[#allocation24_spill] sm:$0xff] %v2875_v2  ;;  %3689 = vst [vmem:[#allocation25_spill] sm:$0xff] %v2879_v3  ;;  %v2883_v5 = vld [vmem:[#allocation10 + $0x20] sm:$0xff]  ;;  %v2887_v6 = vld [vmem:[#allocation10 + $0x28] sm:$0xff]  ;;  %2032 = vmatprep.subr.bf16.mxu1 %v3637_v9  ;;  %v2942_v35 = vshrl.u32 %v564_v22, 7  ;;  %s3244_s22 = sld [smem:[#allocation2]] }
  0xbb   : > { %3690 = vst [vmem:[#allocation26_spill] sm:$0xff] %v2881_v4  ;;  %3691 = vst [vmem:[#allocation27_spill] sm:$0xff] %v2883_v5  ;;  %v2889_v7 = vld [vmem:[#allocation10 + $0x30] sm:$0xff]  ;;  %v2891_v8 = vld [vmem:[#allocation10 + $0x38] sm:$0xff]  ;;  %s481_s25 = scalar_select %p480_p8, %s2652_s8, 1 }
  0xbc   : > { %3692 = vst [vmem:[#allocation28_spill] sm:$0xff] %v2887_v6  ;;  %3693 = vst [vmem:[#allocation29_spill] sm:$0xff] %v2889_v7  ;;  %v2894_v10 = vld [vmem:[#allocation10 + $0x40] sm:$0xff]  ;;  %v2896_v11 = vld [vmem:[#allocation10 + $0x48] sm:$0xff]  ;;  %v2969_v48 = vadd.s32 8, %v2942_v35  ;;  %v2972_v49 = vadd.s32 16, %v2942_v35 }
  0xbd   : > { %3694 = vst [vmem:[#allocation30_spill] sm:$0xff] %v2891_v8  ;;  %3695 = vst [vmem:[#allocation31_spill] sm:$0xff] %v2894_v10  ;;  %v2898_v12 = vld [vmem:[#allocation10 + $0x50] sm:$0xff]  ;;  %v2900_v13 = vld [vmem:[#allocation10 + $0x58] sm:$0xff]  ;;  %v2975_v50 = vadd.s32 24, %v2942_v35  ;;  %v2990_v57 = vadd.s32 32, %v2942_v35 }
  0xbe   : > { %3696 = vst [vmem:[#allocation32_spill] sm:$0xff] %v2896_v11  ;;  %3697 = vst [vmem:[#allocation33_spill] sm:$0xff] %v2898_v12  ;;  %v2902_v14 = vld [vmem:[#allocation10 + $0x60] sm:$0xff]  ;;  %v2904_v15 = vld [vmem:[#allocation10 + $0x68] sm:$0xff]  ;;  %v2993_v58 = vadd.s32 40, %v2942_v35  ;;  %s1713_s4 = sshll.u32 %s481_s25, 2 }
  0xbf   : > { %3698 = vst [vmem:[#allocation34_spill] sm:$0xff] %v2900_v13  ;;  %3699 = vst [vmem:[#allocation35_spill] sm:$0xff] %v2902_v14  ;;  %v2906_v16 = vld [vmem:[#allocation10 + $0x70] sm:$0xff]  ;;  %v2908_v17 = vld [vmem:[#allocation10 + $0x78] sm:$0xff]  ;;  %s483_s30 = scalar_lea.vmem %s3622_s1, %s1713_s4  ;;  %s1714_s24 = sshll.u32 %s481_s25, 3 }
  0xc0   : > { %3700 = vst [vmem:[#allocation36_spill] sm:$0xff] %v2904_v15  ;;  %3701 = vst [vmem:[#allocation37_spill] sm:$0xff] %v2906_v16  ;;  %v2910_v18 = vld [vmem:[#allocation10 + $0x80] sm:$0xff]  ;;  %v2912_v19 = vld [vmem:[#allocation10 + $0x88] sm:$0xff]  ;;  %s487_s7 = scalar_lea.vmem %s3624_s3, %s1714_s24  ;;  %s3272_s19 = smov 1  }
  0xc1   : > { %3702 = vst [vmem:[#allocation38_spill] sm:$0xff] %v2908_v17  ;;  %3703 = vst [vmem:[#allocation39_spill] sm:$0xff] %v2910_v18  ;;  %v2914_v20 = vld [vmem:[#allocation10 + $0x90] sm:$0xff]  ;;  %v2916_v21 = vld [vmem:[#allocation10 + $0x98] sm:$0xff] }
  0xc2   : > { %3704 = vst [vmem:[#allocation40_spill] sm:$0xff] %v2912_v19  ;;  %3705 = vst [vmem:[#allocation41_spill] sm:$0xff] %v2914_v20  ;;  %v2918_v23 = vld [vmem:[#allocation10 + $0xa0] sm:$0xff]  ;;  %v2920_v24 = vld [vmem:[#allocation10 + $0xa8] sm:$0xff] }
  0xc3   : > { %3706 = vst [vmem:[#allocation42_spill] sm:$0xff] %v2916_v21  ;;  %3707 = vst [vmem:[#allocation43_spill] sm:$0xff] %v2918_v23  ;;  %v2922_v25 = vld [vmem:[#allocation10 + $0xb0] sm:$0xff]  ;;  %v2924_v26 = vld [vmem:[#allocation10 + $0xb8] sm:$0xff] }
  0xc4   : > { %3708 = vst [vmem:[#allocation44_spill] sm:$0xff] %v2920_v24  ;;  %v2926_v27 = vld [vmem:[#allocation10 + $0xc0] sm:$0xff]  ;;  %v2928_v28 = vld [vmem:[#allocation10 + $0xc8] sm:$0xff]  ;;  %v2930_v29 = vld [vmem:[#allocation10 + $0xd0] sm:$0xff] }
  0xc5   : > { %3709 = vst [vmem:[#allocation45_spill] sm:$0xff] %v2926_v27  ;;  %3710 = vst [vmem:[#allocation46_spill] sm:$0xff] %v2928_v28  ;;  %v2932_v30 = vld [vmem:[#allocation10 + $0xd8] sm:$0xff]  ;;  %v2934_v31 = vld [vmem:[#allocation10 + $0xe0] sm:$0xff] }
  0xc6   : > { %3711 = vst [vmem:[#allocation47_spill] sm:$0xff] %v2930_v29  ;;  %3712 = vst [vmem:[#allocation48_spill] sm:$0xff] %v2932_v30  ;;  %v2936_v32 = vld [vmem:[#allocation10 + $0xe8] sm:$0xff]  ;;  %v2938_v33 = vld [vmem:[#allocation10 + $0xf0] sm:$0xff] }
  0xc7   : > { %3713 = vst [vmem:[#allocation49_spill] sm:$0xff] %v2934_v31  ;;  %3714 = vst [vmem:[#allocation50_spill] sm:$0xff] %v2936_v32  ;;  %v2940_v34 = vld [vmem:[#allocation10 + $0xf8] sm:$0xff]  ;;  %v2944_v36 = vld [vmem:[#allocation10 + $0x100] sm:$0xff]  ;;  %v3655_v32 = vstv %s3244_s22 }
  0xc8   : > { %3715 = vst [vmem:[#allocation51_spill] sm:$0xff] %v2938_v33  ;;  %3716 = vst [vmem:[#allocation52_spill] sm:$0xff] %v2940_v34  ;;  %v2946_v37 = vld [vmem:[#allocation10 + $0x108] sm:$0xff]  ;;  %v2948_v38 = vld [vmem:[#allocation10 + $0x110] sm:$0xff] }
  0xc9   : > { %3717 = vst [vmem:[#allocation53_spill] sm:$0xff] %v2944_v36  ;;  %3718 = vst [vmem:[#allocation54_spill] sm:$0xff] %v2946_v37  ;;  %v2950_v39 = vld [vmem:[#allocation10 + $0x118] sm:$0xff]  ;;  %v2952_v40 = vld [vmem:[#allocation10 + $0x120] sm:$0xff] }
  0xca   : > { %3719 = vst [vmem:[#allocation55_spill] sm:$0xff] %v2948_v38  ;;  %3720 = vst [vmem:[#allocation56_spill] sm:$0xff] %v2950_v39  ;;  %v2954_v41 = vld [vmem:[#allocation10 + $0x128] sm:$0xff]  ;;  %v2956_v42 = vld [vmem:[#allocation10 + $0x130] sm:$0xff] }
  0xcb   : > { %3721 = vst [vmem:[#allocation57_spill] sm:$0xff] %v2952_v40  ;;  %3722 = vst [vmem:[#allocation58_spill] sm:$0xff] %v2954_v41  ;;  %v2958_v43 = vld [vmem:[#allocation10 + $0x138] sm:$0xff]  ;;  %v2960_v44 = vld [vmem:[#allocation10 + $0x140] sm:$0xff] }
  0xcc   : > { %3723 = vst [vmem:[#allocation59_spill] sm:$0xff] %v2956_v42  ;;  %3724 = vst [vmem:[#allocation60_spill] sm:$0xff] %v2958_v43  ;;  %v2962_v45 = vld [vmem:[#allocation10 + $0x148] sm:$0xff]  ;;  %v2964_v46 = vld [vmem:[#allocation10 + $0x150] sm:$0xff] }
  0xcd   : > { %3725 = vst [vmem:[#allocation61_spill] sm:$0xff] %v2960_v44  ;;  %3726 = vst [vmem:[#allocation62_spill] sm:$0xff] %v2962_v45  ;;  %v2966_v47 = vld [vmem:[#allocation10 + $0x158] sm:$0xff]  ;;  %v2977_v51 = vld [vmem:[#allocation10 + $0x160] sm:$0xff]  ;;  %v3764_v45 = vmov 0.0|0.0  }
  0xce   : > { %3727 = vst [vmem:[#allocation63_spill] sm:$0xff] %v2964_v46  ;;  %3728 = vst [vmem:[#allocation64_spill] sm:$0xff] %v2966_v47  ;;  %v2979_v52 = vld [vmem:[#allocation10 + $0x168] sm:$0xff]  ;;  %v2981_v53 = vld [vmem:[#allocation10 + $0x170] sm:$0xff] }
  0xcf   : > { %3729 = vst [vmem:[#allocation65_spill] sm:$0xff] %v2977_v51  ;;  %3730 = vst [vmem:[#allocation66_spill] sm:$0xff] %v2979_v52  ;;  %v2983_v54 = vld [vmem:[#allocation10 + $0x178] sm:$0xff]  ;;  %v2985_v55 = vld [vmem:[#allocation10 + $0x180] sm:$0xff]  ;;  %v3758_v51 = vcvt.s32.f32 %v2993_v58 }
  0xd0   : > { %3731 = vst [vmem:[#allocation67_spill] sm:$0xff] %v2981_v53  ;;  %3732 = vst [vmem:[#allocation68_spill] sm:$0xff] %v2983_v54  ;;  %v2987_v56 = vld [vmem:[#allocation10 + $0x188] sm:$0xff]  ;;  %v2995_v59 = vld [vmem:[#allocation10 + $0x190] sm:$0xff]  ;;  %v3751_v53 = vcvt.s32.f32 %v2972_v49  ;;  %v3077_v54 = vadd.s32 72, %v2942_v35 }
  0xd1   : > { %3733 = vst [vmem:[#allocation69_spill] sm:$0xff] %v2985_v55  ;;  %3734 = vst [vmem:[#allocation70_spill] sm:$0xff] %v2987_v56  ;;  %v2997_v60 = vld [vmem:[#allocation10 + $0x198] sm:$0xff]  ;;  %v2999_v61 = vld [vmem:[#allocation10 + $0x1a0] sm:$0xff]  ;;  %v3029_v55 = vadd.s32 56, %v2942_v35  ;;  %v3752_v56 = vcvt.s32.f32 %v2975_v50 }
  0xd2   : > { %3735 = vst [vmem:[#allocation71_spill] sm:$0xff] %v2995_v59  ;;  %3736 = vst [vmem:[#allocation72_spill] sm:$0xff] %v2997_v60  ;;  %v3001_v62 = vld [vmem:[#allocation10 + $0x1a8] sm:$0xff]  ;;  %v3003_v63 = vld [vmem:[#allocation10 + $0x1b0] sm:$0xff]  ;;  %v3639_v47 = vcvt.s32.f32 %v3077_v54 }
  0xd3   : > { %3737 = vst [vmem:[#allocation73_spill] sm:$0xff] %v2999_v61  ;;  %3738 = vst [vmem:[#allocation74_spill] sm:$0xff] %v3001_v62  ;;  %v3005_v22 = vld [vmem:[#allocation10 + $0x1b8] sm:$0xff]  ;;  %v3011_v59 = vld [vmem:[#allocation10 + $0x1c0] sm:$0xff]  ;;  %v3763_v46 = vcvt.s32.f32 %v3029_v55 }
  0xd4   : > { %3739 = vst [vmem:[#allocation75_spill] sm:$0xff] %v3003_v63  ;;  %3740 = vst [vmem:[#allocation76_spill] sm:$0xff] %v3005_v22  ;;  %v3013_v60 = vld [vmem:[#allocation10 + $0x1c8] sm:$0xff]  ;;  %v3015_v61 = vld [vmem:[#allocation10 + $0x1d0] sm:$0xff]  ;;  %v3018_v63 = vadd.s32 48, %v2942_v35 }
  0xd5   : > { %3741 = vst [vmem:[#allocation77_spill] sm:$0xff] %v3011_v59  ;;  %3742 = vst [vmem:[#allocation78_spill] sm:$0xff] %v3013_v60  ;;  %v3020_v22 = vld [vmem:[#allocation10 + $0x1d8] sm:$0xff]  ;;  %v3022_v9 = vld [vmem:[#allocation10 + $0x1e0] sm:$0xff] }
  0xd6   : > { %3743 = vst [vmem:[#allocation79_spill] sm:$0xff] %v3015_v61  ;;  %3744 = vst [vmem:[#allocation80_spill] sm:$0xff] %v3020_v22  ;;  %v3024_v62 = vld [vmem:[#allocation10 + $0x1e8] sm:$0xff]  ;;  %v3031_v59 = vld [vmem:[#allocation10 + $0x1f0] sm:$0xff]  ;;  %v3749_v22 = vcvt.s32.f32 %v2942_v35  ;;  %v3762_v52 = vcvt.s32.f32 %v3018_v63 }
  0xd7   : > { %3745 = vst [vmem:[#allocation81_spill] sm:$0xff] %v3022_v9  ;;  %3746 = vst [vmem:[#allocation82_spill] sm:$0xff] %v3024_v62  ;;  %v3033_v60 = vld [vmem:[#allocation10 + $0x1f8] sm:$0xff]  ;;  %v3750_v9 = vcvt.s32.f32 %v2969_v48  ;;  %v3060_v62 = vadd.s32 64, %v2942_v35 }
  0xd8   : > { %3747 = vst [vmem:[#allocation83_spill] sm:$0xff] %v3031_v59  ;;  %3748 = vst [vmem:[#allocation84_spill] sm:$0xff] %v3033_v60  ;;  %v3037_v61 = vld [vmem:[%s418_s27] ss:$0 sm:$0xff]  ;;  %v3122_v60 = vadd.s32 104, %v2942_v35  ;;  %s1712_s27 = sshll.u32 %s2840_s17, 5 }
  0xd9   : > { %vm605_vm0 = vcmp.eq.f32.partialorder %v3749_v22, %v3037_v61  ;;  %vm606_vm1 = vcmp.eq.f32.partialorder %v3750_v9, %v3037_v61  ;;  %vm607_vm2 = vcmp.eq.f32.partialorder %v3751_v53, %v3037_v61  ;;  %vm608_vm3 = vcmp.eq.f32.partialorder %v3752_v56, %v3037_v61  ;;  %v3052_v59 = vld [vmem:[%s2844_s12] sm:$0xff]   ;;  %s3263_s20 = scalar_lea.vmem [#allocation13], %s1712_s27 }
  0xda   : > { %vm3054_vm4 = vmpackc.low %vm606_vm1, %vm605_vm0  ;;  %v2561_v9 = vmov 1.0|1.0   ;;  %v3757_v56 = vcvt.s32.f32 %v2990_v57  ;;  %vm610_vm7 = vcmp.eq.f32.partialorder %v3758_v51, %v3037_v61  ;;  %1909 = vmatprep.mubr.bf16.mxu0 %v3052_v59  ;;  %v3091_v51 = vadd.s32 80, %v2942_v35  ;;  %v495_v53 = vld [vmem:[%s3626_s5] sm:$0xff] }
  0xdb   : > { %1893 = vmatprep.subr.msk.bf16.mxu0 %vm3054_vm4, %v2561_v9  ;;  %vm3065_vm5 = vmpackc.low %vm608_vm3, %vm607_vm2  ;;  %v3094_v22 = vadd.s32 88, %v2942_v35  ;;  %2034 = vmatpush3.bf16.msk.msra.mxu1 %vm3054_vm4, %v2561_v9  ;;  %vm611_vm9 = vcmp.eq.f32.partialorder %v3762_v52, %v3037_v61  ;;  %vm612_vm10 = vcmp.eq.f32.partialorder %v3763_v46, %v3037_v61  ;;  %v3640_v44 = vcvt.s32.f32 %v3060_v62  ;;  %v597_v37 = vld [vmem:[%s487_s7] sm:$0xff]  }
  0xdc   : > { %vm609_vm6 = vcmp.eq.f32.partialorder %v3757_v56, %v3037_v61  ;;  %1894 = vmatpush3.bf16.msk.msra.mxu0 %vm3054_vm4, %v2561_v9  ;;  %2035 = vmatprep.subr.bf16.mxu1 %v3764_v45  ;;  %vm3114_vm11 = vmpackc.low %vm612_vm10, %vm611_vm9  ;;  %v3119_v46 = vadd.s32 96, %v2942_v35  ;;  %vm614_vm13 = vcmp.eq.f32.partialorder %v3639_v47, %v3037_v61  ;;  %v3642_v42 = vcvt.s32.f32 %v3091_v51 }
  0xdd   : > { %1895 = vmatprep.subr.msk.bf16.mxu0 %vm3065_vm5, %v2561_v9  ;;  %vm3086_vm8 = vmpackc.low %vm610_vm7, %vm609_vm6  ;;  %3761 = vst [vmem:[#allocation85_spill] sm:$0xff] %v3094_v22  ;;  %vm613_vm12 = vcmp.eq.f32.partialorder %v3640_v44, %v3037_v61  ;;  %v3641_v40 = vcvt.s32.f32 %v3094_v22  ;;  %v3147_v47 = vadd.s32 112, %v2942_v35  ;;  %v3150_v44 = vadd.s32 120, %v2942_v35 }
  0xde   : > { %vm3142_vm14 = vmpackc.low %vm614_vm13, %vm613_vm12  ;;  %vm615_vm15 = vcmp.eq.f32.partialorder %v3642_v42, %v3037_v61  ;;  %v3646_v43 = vcvt.s32.f32 %v3119_v46  ;;  %v3645_v41 = vcvt.s32.f32 %v3122_v60  ;;  %v2563_v52 = vmov 0.0  }
  0xdf   : > { %2037 = vmatpush3.bf16.msk.msra.mxu1 %vm3065_vm5, %v2561_v9  ;;  %3769 = vst [vmem:[#allocation86_spill] sm:$0xff] %v3147_v47  ;;  %3770 = vst [vmem:[#allocation87_spill] sm:$0xff] %v3150_v44  ;;  %vm616_vm0 = vcmp.eq.f32.partialorder %v3641_v40, %v3037_v61  ;;  %v3644_v40 = vcvt.s32.f32 %v3147_v47  ;;  %v3643_v42 = vcvt.s32.f32 %v3150_v44  ;;  %v3647_v56 = vmov 0  }
  0xe0   : > { %1896 = vmatpush3.bf16.msk.msra.mxu0 %vm3065_vm5, %v2561_v9  ;;  %2038 = vmatprep.subr.bf16.mxu1 %v3764_v45  ;;  %vm3170_vm1 = vmpackc.low %vm616_vm0, %vm615_vm15  ;;  %vm617_vm2 = vcmp.eq.f32.partialorder %v3646_v43, %v3037_v61  ;;  %vm618_vm3 = vcmp.eq.f32.partialorder %v3645_v41, %v3037_v61  ;;  %vm804_vm9 = vcmask 261120  }
  0xe1   : > { %1897 = vmatprep.subr.msk.bf16.mxu0 %vm3086_vm8, %v2561_v9  ;;  %vm1747_vm4 = vmpackc.low %vm618_vm3, %vm617_vm2  ;;  %vm619_vm5 = vcmp.eq.f32.partialorder %v3644_v40, %v3037_v61  ;;  %vm620_vm6 = vcmp.eq.f32.partialorder %v3643_v42, %v3037_v61  ;;  %v3214_v61 = vld [vmem:[%s2844_s12 + $0x8] sm:$0xff]   ;;  %2289 = vset.pattern.permute.xlu0 %v3647_v56  ;;  %v3234_v56 = vld [vmem:[#allocation9] sm:$0xf] }
  0xe2   : > { %vm1749_vm7 = vmpackc.low %vm620_vm6, %vm619_vm5  ;;  %3773 = vst [vmem:[#allocation88_spill] sm:$0xff] %v3214_v61  ;;  %794 = vperm.xlu0 %2289, %v495_v53  }
  0xe3   : > { %2040 = vmatpush3.bf16.msk.msra.mxu1 %vm3086_vm8, %v2561_v9  ;;  %3775 = vst [vmem:[#allocation90_spill] sm:$0xff] %v3234_v56 }
  0xe4   : > { %1898 = vmatpush3.bf16.msk.msra.mxu0 %vm3086_vm8, %v2561_v9  ;;  %2041 = vmatprep.subr.bf16.mxu1 %v3764_v45  ;;  %vm2562_vm8 = vmmov 0  }
  0xe5   : > { %1899 = vmatprep.subr.msk.bf16.mxu0 %vm3114_vm11, %v2561_v9  ;;  %1945 = vmatprep.mubr.msk.f32.mxu1 %vm2562_vm8, %v2563_v52 }
  0xe7   : > { %2043 = vmatpush3.bf16.msk.msra.mxu1 %vm3114_vm11, %v2561_v9 }
  0xe8   : > { %1900 = vmatpush3.bf16.msk.msra.mxu0 %vm3114_vm11, %v2561_v9  ;;  %2044 = vmatprep.subr.bf16.mxu1 %v3764_v45 }
  0xe9   : > { %1901 = vmatprep.subr.msk.bf16.mxu0 %vm3142_vm14, %v2561_v9 }
  0xeb   : > { %2046 = vmatpush3.bf16.msk.msra.mxu1 %vm3142_vm14, %v2561_v9 }
  0xec   : > { %1902 = vmatpush3.bf16.msk.msra.mxu0 %vm3142_vm14, %v2561_v9  ;;  %2047 = vmatprep.subr.bf16.mxu1 %v3764_v45 }
  0xed   : > { %1903 = vmatprep.subr.msk.bf16.mxu0 %vm3170_vm1, %v2561_v9 }
  0xef   : > { %2049 = vmatpush3.bf16.msk.msra.mxu1 %vm3170_vm1, %v2561_v9 }
  0xf0   : > { %1904 = vmatpush3.bf16.msk.msra.mxu0 %vm3170_vm1, %v2561_v9  ;;  %2050 = vmatprep.subr.bf16.mxu1 %v3764_v45 }
  0xf1   : > { %1905 = vmatprep.subr.msk.bf16.mxu0 %vm1747_vm4, %v2561_v9 }
  0xf3   : > { %2052 = vmatpush3.bf16.msk.msra.mxu1 %vm1747_vm4, %v2561_v9 }
  0xf4   : > { %1906 = vmatpush3.bf16.msk.msra.mxu0 %vm1747_vm4, %v2561_v9  ;;  %2053 = vmatprep.subr.bf16.mxu1 %v3764_v45 }
  0xf5   : > { %1907 = vmatprep.subr.msk.bf16.mxu0 %vm1749_vm7, %v2561_v9 }
  0xf7   : > { %2055 = vmatpush3.bf16.msk.msra.mxu1 %vm1749_vm7, %v2561_v9 }
  0xf8   : > { %1908 = vmatpush3.bf16.msk.msra.mxu0 %vm1749_vm7, %v2561_v9  ;;  %v3230_v9 = vld [vmem:[%s483_s30] sm:$0xf] }
  0xf9   : > { %2056 = vmatprep.subr.bf16.mxu0 %v3764_v45  ;;  %3774 = vst [vmem:[#allocation89_spill] sm:$0xff] %v3230_v9 }
  0xfa   : > { %1946 = vmatmul.mubr.f32.vlgmr.msra.gmra.mrb[0].mxu1 %v3230_v9 }
  0xfb   : > { %1910 = vmatmul.mubr.bf16.vlgmr.msra.gmra.mrb[0].mxu0 %v3214_v61 }
  0xfc   : > { %1956 = vmatprep.mubr.msk.f32.mxu0 %vm2562_vm8, %v2563_v52 }
 0x161   : > { %v3241_v39 = vpop.permute.xlu0 %794 }
 0x162   : > { %3776 = vst [vmem:[#allocation91_spill] sm:$0xff] %v3241_v39 }
 0x1cd   : > { %v788_v53 = vpop.f32.mrb[0].mxu1 }
 0x1ce   : > { %v1911_v52 = vpop.f32.mrb[0].mxu0  ;;  %v1947_v36 = vpop.f32.mrb[1].mxu1  ;;  %v893_v47 = vrot.slane %v788_v53, 7 }
 0x1cf   : > { %v707_v42 = vpop.f32.mrb[1].mxu0 }
 0x1d0   : > { %v1912_v40 = vpop.f32.mrb[2].mxu0 }
 0x1d1   : > { %v2060_v41 = vpack.c.bf16 %v1912_v40, %v1911_v52  ;;  %v710_v43 = vpop.f32.mrb[3].mxu0 }
 0x1d2   : > { %v2057_v38 = vpack.c.bf16 %v710_v43, %v707_v42 }
 0x1d4   : > { %2058 = vmatpush3.bf16.msra.mxu0 %v2057_v38  ;;  %v797_v38 = vmul.f32 %v3241_v39, %v597_v37  ;;  %v3657_v39 = vsub.s32 1, %v2942_v35 }
 0x1d5   : > { %2059 = vmatprep.subr.bf16.mxu0 %v3764_v45 }
 0x1d6   : > { %v798_v45 = vrot.slane %v797_v38, 4 }
 0x1d8   : > { %2061 = vmatpush3.bf16.msra.mxu0 %v2060_v41  ;;  %v799_v41 = vadd.f32 %v798_v45, %v797_v38  ;;  %v3777_v45 = vmov 0  }
 0x1da   : > { %v800_v33 = vrot.slane %v799_v41, 2 }
 0x1db   : > { %1957 = vmatmul.mubr.msk.f32.vlgmr.msra.gmra.mrb[4].mxu0 %vm804_vm9, %v3234_v56 }
 0x1dc   : > { %v801_v31 = vadd.f32 %v800_v33, %v799_v41 }
 0x1de   : > { %v802_v56 = vrot.slane %v801_v31, 1 }
 0x1e0   : > { %v803_v36 = vadd.f32 %v802_v56, %v801_v31  ;;  %v3656_v56 = vsub.s32 2, %v2942_v35 }
 0x2ae   : > { %v874_v34 = vpop.f32.mrb[4].mxu0 }
 0x2af   : > { %v875_v9 = vadd.f32 %v874_v34, %v803_v36  ;;  %v1958_v61 = vpop.f32.mrb[5].mxu0 }
 0x2b1   : > { %v879_v44 = vadd.f32 %v3655_v32, %v875_v9 }
 0x2b3   : > { %v881_v29 = vrot.slane %v879_v44, 7 }
 0x2b5   : > { %vm883_vm10 = vcmp.gt.f32.partialorder %v879_v44, %v881_v29 }
 0x2b6   : > { %v884_v38 = vsel %vm883_vm10, %v879_v44, %v881_v29  ;;  %v885_v33 = vsel %vm883_vm10, 1, %v3777_v45  ;;  %v895_v41 = vsel %vm883_vm10, %v788_v53, %v893_v47  ;;  %v3258_v47 = vsub.s32 3, %v2942_v35 }
 0x2b7   : > { %v889_v27 = vrot.slane %v885_v33, %v3657_v39  ;;  %v897_v31 = vrot.slane %v884_v38, 7  ;;  %v909_v34 = vrot.slane %v895_v41, 7 }
 0x2b9   : > { %vm890_vm11 = vcmp.eq.s32.totalorder %v889_v27, 1  ;;  %vm899_vm12 = vcmp.gt.f32.partialorder %v879_v44, %v897_v31 }
 0x2ba   : > { %v891_v61 = vsel %vm890_vm11, %v710_v43, %v707_v42  ;;  %v900_v9 = vsel %vm899_vm12, %v879_v44, %v897_v31  ;;  %v901_v36 = vsel %vm899_vm12, 1, %v3777_v45  ;;  %v911_v32 = vsel %vm899_vm12, %v788_v53, %v909_v34 }
 0x2bb   : > { %v905_v29 = vrot.slane %v901_v36, %v3656_v56  ;;  %v913_v30 = vrot.slane %v900_v9, 7  ;;  %v924_v28 = vrot.slane %v911_v32, 7 }
 0x2bd   : > { %vm906_vm13 = vcmp.eq.s32.totalorder %v905_v29, 1  ;;  %vm915_vm14 = vcmp.gt.f32.partialorder %v879_v44, %v913_v30 }
 0x2be   : > { %v907_v38 = vsel %vm906_vm13, %v1911_v52, %v891_v61  ;;  %v916_v27 = vsel %vm915_vm14, 1, %v3777_v45  ;;  %v926_v33 = vsel %vm915_vm14, %v788_v53, %v924_v28  }
 0x2bf   : > { %v920_v42 = vrot.slane %v916_v27, %v3258_v47 }
 0x2c1   : > { %vm921_vm15 = vcmp.eq.s32.totalorder %v920_v42, 1 }
 0x2c2   : > { %v922_v43 = vsel %vm921_vm15, %v1912_v40, %v907_v38  }
 0x2c3   : > { %927 = vst [vmem:[%s3263_s20] sm:$0xff] %v922_v43 }
 0x2c4 LB: >> { %v2565_v28 = vmov 0.0|0.0   ;;  %v2063_v30 = vpack.c.bf16 %v2541_v37, %v2545_v43  ;;  %vm2566_vm0 = vmmov 0   ;;  %v2567_v32 = vmov 0.0   ;;  %v3778_v2 = vld [vmem:[#allocation24_spill] sm:$0xff]  ;;  %v3779_v4 = vld [vmem:[#allocation26_spill] sm:$0xff]  ;;  %v3780_v1 = vld [vmem:[#allocation23_spill] sm:$0xff]  ;;  %s2549_s19 = sphi %s3272_s19, %s933_s19   ;;  %v2545_v43 = vphi %v922_v43, %v1511_v43   ;;  %v2541_v37 = vphi %v597_v37, %v3537_v37   ;;  %v2537_v33 = vphi %v926_v33, %v1515_v33  }
 0x2c5   : >> { %2062 = vmatprep.subr.bf16.mxu0 %v2565_v28  ;;  %1963 = vmatprep.mubr.msk.f32.mxu0 %vm2566_vm0, %v2567_v32  ;;  %v2065_v40 = vpack.c.bf16 %v3779_v4, %v3778_v2  ;;  %v3781_v3 = vld [vmem:[#allocation25_spill] sm:$0xff]  ;;  %v3782_v6 = vld [vmem:[#allocation28_spill] sm:$0xff]  ;;  %v3783_v8 = vld [vmem:[#allocation30_spill] sm:$0xff]  ;;  %vm937_vm1 = vcmask 130048   ;;  %v1115_v53 = vrot.slane %v2537_v33, %v3258_v47  ;;  %v3784_v45 = vcvt.s32.f32 %v2942_v35  ;;  %s1818_s25 = sshll.u32 %s2549_s19, 3  ;;  %s933_s19 = sadd.s32 1, %s2549_s19  }
 0x2c6   : >> { %v2067_v44 = vpack.c.bf16 %v3781_v3, %v3780_v1  ;;  %v2069_v52 = vpack.c.bf16 %v3783_v8, %v3782_v6  ;;  %2064 = vmatpush3.bf16.msra.mxu0 %v2063_v30  ;;  %v3785_v41 = vcvt.s32.f32 %v2969_v48  ;;  %v3786_v31 = vcvt.s32.f32 %v2972_v49  ;;  %v3788_v0 = vld [vmem:[#allocation22_spill] sm:$0xff]  ;;  %v3791_v5 = vld [vmem:[#allocation27_spill] sm:$0xff]  ;;  %v3792_v7 = vld [vmem:[#allocation29_spill] sm:$0xff]  ;;  %s1517_s0 = scalar_lea.vmem %s3263_s20, %s1818_s25 [#allocation13]  ;;  %p930_p13 = scmp.ge.s32.totalorder %s933_s19, 4  }
 0x2c7   : >> { %2066 = vmatprep.subr.bf16.mxu1 %v2065_v40  ;;  %vm1116_vm2 = vcmp.eq.f32.partialorder %v3784_v45, %v1115_v53  ;;  %v3787_v34 = vcvt.s32.f32 %v2975_v50  ;;  %v2071_v9 = vpack.c.bf16 %v3792_v7, %v3791_v5  ;;  %v2568_v36 = vmov 1.0|1.0   ;;  %v3797_v11 = vld [vmem:[#allocation32_spill] sm:$0xff]  ;;  %v3798_v13 = vld [vmem:[#allocation34_spill] sm:$0xff]  ;;  %v3801_v10 = vld [vmem:[#allocation31_spill] sm:$0xff]  ;;  %s1825_s11 = sshll.u32 (%p930_p13), %s2652_s8, 9 }
 0x2c8   : >> { %2068 = vmatpush1.bf16.msra.mxu1 %v2067_v44  ;;  %vm1117_vm3 = vcmp.eq.f32.partialorder %v3785_v41, %v1115_v53  ;;  %vm1118_vm4 = vcmp.eq.f32.partialorder %v3786_v31, %v1115_v53  ;;  %v3795_v38 = vcvt.s32.f32 %v2990_v57  ;;  %v3796_v27 = vcvt.s32.f32 %v2993_v58  ;;  %v3802_v12 = vld [vmem:[#allocation33_spill] sm:$0xff]  ;;  %v3805_v15 = vld [vmem:[#allocation36_spill] sm:$0xff]  ;;  %v3806_v17 = vld [vmem:[#allocation38_spill] sm:$0xff]  ;;  %s3574_s13 = scalar_lea.hbm (%p930_p13), %s3631_s10, %s1825_s11  ;;  %s1533_s30 = sshll.u32 (%p930_p13), %s3263_s20, 4  ;;  %s3577_s30 = int_to_ptr.vmem [resolvable:$true] %s1533_s30 }
 0x2c9   : >> { %vm1119_vm5 = vcmp.eq.f32.partialorder %v3787_v34, %v1115_v53  ;;  %2070 = vmatprep.subr.bf16.mxu1 %v2069_v52  ;;  %1964 = vmatmul.mubr.msk.f32.vlgmr.msra.gmra.mrb[0].mxu0 %vm937_vm1, %v3788_v0  ;;  %vm3305_vm6 = vmpackc.low %vm1117_vm3, %vm1116_vm2  ;;  %v2073_v33 = vpack.c.bf16 %v3798_v13, %v3797_v11  ;;  %v2075_v30 = vpack.c.bf16 %v3802_v12, %v3801_v10  ;;  %v3803_v40 = vcvt.s32.f32 %v3018_v63  ;;  %v3809_v14 = vld [vmem:[#allocation35_spill] sm:$0xff]  ;;  %v3810_v16 = vld [vmem:[#allocation37_spill] sm:$0xff]  ;;  %s1520_s24 = scalar_lea.sflag (%p930_p13), [#allocation5], %s2840_s17  ;;  %s2435_s23 = scalar_lea.vmem (%p930_p13), %s3577_s30, 512 }
 0x2ca   : >> { %1966 = vmatprep.subr.msk.bf16.mxu0 %vm3305_vm6, %v2568_v36  ;;  %vm3314_vm7 = vmpackc.low %vm1119_vm5, %vm1118_vm4  ;;  %vm1120_vm8 = vcmp.eq.f32.partialorder %v3795_v38, %v1115_v53  ;;  %vm1121_vm10 = vcmp.eq.f32.partialorder %v3796_v27, %v1115_v53  ;;  %1982 = vmatprep.mubr.bf16.mxu0 %v3052_v59  ;;  %v3804_v44 = vcvt.s32.f32 %v3029_v55  ;;  %v2077_v52 = vpack.c.bf16 %v3806_v17, %v3805_v15  ;;  %v3813_v19 = vld [vmem:[#allocation40_spill] sm:$0xff]  ;;  %v3814_v21 = vld [vmem:[#allocation42_spill] sm:$0xff]  ;;  %p2436_p4 = scmp.ne.s32.totalorder (%p930_p13), %s3577_s30, %s2435_s23  ;;  %p3883_p0 = scmp.ne.s32.totalorder (%p930_p13), %s3674_s28, 0 }
 0x2cb   : >> { %1967 = vmatpush3.bf16.msk.msra.mxu0 %vm3305_vm6, %v2568_v36  ;;  %vm3331_vm11 = vmpackc.low %vm1121_vm10, %vm1120_vm8  ;;  %vm1122_vm12 = vcmp.eq.f32.partialorder %v3803_v40, %v1115_v53  ;;  %v2079_v41 = vpack.c.bf16 %v3810_v16, %v3809_v14  ;;  %v3811_v31 = vcvt.s32.f32 %v3060_v62  ;;  %v3812_v34 = vcvt.s32.f32 %v3077_v54  ;;  %v3817_v18 = vld [vmem:[#allocation39_spill] sm:$0xff]  ;;  %v3818_v20 = vld [vmem:[#allocation41_spill] sm:$0xff] }
 0x2cc   : >> { %1968 = vmatprep.subr.msk.bf16.mxu0 %vm3314_vm7, %v2568_v36  ;;  %2072 = vmatpush1.bf16.msra.mxu1 %v2071_v9  ;;  %vm1123_vm13 = vcmp.eq.f32.partialorder %v3804_v44, %v1115_v53  ;;  %v2081_v9 = vpack.c.bf16 %v3814_v21, %v3813_v19  ;;  %v2083_v27 = vpack.c.bf16 %v3818_v20, %v3817_v18  ;;  %v3820_v22 = vld [vmem:[#allocation85_spill] sm:$0xff]  ;;  %v3822_v24 = vld [vmem:[#allocation44_spill] sm:$0xff]  ;;  %v3825_v23 = vld [vmem:[#allocation43_spill] sm:$0xff]  ;;  %p2437_p5 = pnand (%p930_p13), %p2436_p4, %p3883_p0 }
 0x2cd   : >> { %2074 = vmatprep.subr.bf16.mxu1 %v2073_v33  ;;  %vm3349_vm14 = vmpackc.low %vm1123_vm13, %vm1122_vm12  ;;  %vm1124_vm15 = vcmp.eq.f32.partialorder %v3811_v31, %v1115_v53  ;;  %vm1125_vm1 = vcmp.eq.f32.partialorder %v3812_v34, %v1115_v53  ;;  %v3819_v33 = vcvt.s32.f32 %v3091_v51  ;;  %v2085_v40 = vpack.c.bf16 %v2924_v26, %v3822_v24  ;;  %v3828_v34 = vld [vmem:[#allocation46_spill] sm:$0xff]  ;;  %v3843_v29 = vld [vmem:[#allocation52_spill] sm:$0xff] }
 0x2ce   : >> { %vm3367_vm2 = vmpackc.low %vm1125_vm1, %vm1124_vm15  ;;  %v3827_v31 = vcvt.s32.f32 %v3122_v60  ;;  %v3842_v61 = vld [vmem:[#allocation50_spill] sm:$0xff]  ;;  %v3844_v45 = vld [vmem:[#allocation49_spill] sm:$0xff]  ;;  %p2438_p7 = pneg (%p930_p13), %p2437_p5 }
 0x2cf   : >> { %1969 = vmatpush3.bf16.msk.msra.mxu0 %vm3314_vm7, %v2568_v36  ;;  %vm1126_vm3 = vcmp.eq.f32.partialorder %v3819_v33, %v1115_v53  ;;  %v2093_v42 = vpack.c.bf16 %v3843_v29, %v3842_v61  ;;  %v3845_v38 = vld [vmem:[#allocation51_spill] sm:$0xff]  ;;  %v3854_v61 = vld [vmem:[#allocation62_spill] sm:$0xff]  ;;  %v3855_v29 = vld [vmem:[#allocation64_spill] sm:$0xff] }
 0x2d0   : >> { %1970 = vmatprep.subr.msk.bf16.mxu0 %vm3331_vm11, %v2568_v36  ;;  %2076 = vmatpush1.bf16.msra.mxu1 %v2075_v30  ;;  %v3821_v30 = vcvt.s32.f32 %v3820_v22  ;;  %vm1129_vm10 = vcmp.eq.f32.partialorder %v3827_v31, %v1115_v53  ;;  %v2095_v44 = vpack.c.bf16 %v3845_v38, %v3844_v45  ;;  %v3856_v45 = vld [vmem:[#allocation61_spill] sm:$0xff]  ;;  %v3857_v38 = vld [vmem:[#allocation63_spill] sm:$0xff] }
 0x2d1   : >> { %2078 = vmatprep.subr.bf16.mxu1 %v2077_v52  ;;  %v2087_v52 = vpack.c.bf16 %v2922_v25, %v3825_v23  ;;  %v3879_v7 = vld [vmem:[#allocation91_spill] sm:$0xff] }
 0x2d2   : >> { %vm1127_vm4 = vcmp.eq.f32.partialorder %v3821_v30, %v1115_v53  ;;  %v3832_v30 = vld [vmem:[#allocation45_spill] sm:$0xff] }
 0x2d3   : >> { %1971 = vmatpush3.bf16.msk.msra.mxu0 %vm3331_vm11, %v2568_v36  ;;  %vm3385_vm5 = vmpackc.low %vm1127_vm4, %vm1126_vm3 }
 0x2d4   : >> { %1972 = vmatprep.subr.msk.bf16.mxu0 %vm3349_vm14, %v2568_v36  ;;  %2080 = vmatpush1.bf16.msra.mxu1 %v2079_v41  ;;  %v3826_v41 = vcvt.s32.f32 %v3119_v46 }
 0x2d5   : >> { %2082 = vmatprep.subr.bf16.mxu1 %v2081_v9  ;;  %v3829_v9 = vld [vmem:[#allocation48_spill] sm:$0xff] }
 0x2d6   : >> { %vm1128_vm8 = vcmp.eq.f32.partialorder %v3826_v41, %v1115_v53  ;;  %v2089_v33 = vpack.c.bf16 %v3829_v9, %v3828_v34  ;;  %v3833_v41 = vld [vmem:[#allocation47_spill] sm:$0xff] }
 0x2d7   : >> { %1973 = vmatpush3.bf16.msk.msra.mxu0 %vm3349_vm14, %v2568_v36  ;;  %vm3403_vm12 = vmpackc.low %vm1129_vm10, %vm1128_vm8  ;;  %v2091_v31 = vpack.c.bf16 %v3833_v41, %v3832_v30  ;;  %v3836_v34 = vld [vmem:[#allocation87_spill] sm:$0xff]  ;;  %v3847_v30 = vld [vmem:[#allocation56_spill] sm:$0xff] }
 0x2d8   : >> { %1974 = vmatprep.subr.msk.bf16.mxu0 %vm3367_vm2, %v2568_v36  ;;  %2084 = vmatpush1.bf16.msra.mxu1 %v2083_v27  ;;  %v3837_v9 = vcvt.s32.f32 %v3836_v34  ;;  %v3848_v41 = vld [vmem:[#allocation53_spill] sm:$0xff]  ;;  %v3850_v34 = vld [vmem:[#allocation58_spill] sm:$0xff] }
 0x2d9   : >> { %2086 = vmatprep.subr.bf16.mxu1 %v2085_v40  ;;  %v3834_v40 = vld [vmem:[#allocation86_spill] sm:$0xff] }
 0x2da   : >> { %v3835_v56 = vcvt.s32.f32 %v3834_v40  ;;  %vm1131_vm15 = vcmp.eq.f32.partialorder %v3837_v9, %v1115_v53 }
 0x2db   : >> { %1975 = vmatpush3.bf16.msk.msra.mxu0 %vm3367_vm2, %v2568_v36 }
 0x2dc   : >> { %1976 = vmatprep.subr.msk.bf16.mxu0 %vm3385_vm5, %v2568_v36  ;;  %2088 = vmatpush1.bf16.msra.mxu1 %v2087_v52  ;;  %vm1130_vm13 = vcmp.eq.f32.partialorder %v3835_v56, %v1115_v53  ;;  %v3840_v56 = vld [vmem:[#allocation88_spill] sm:$0xff]  ;;  %v3841_v53 = vld [vmem:[#allocation89_spill] sm:$0xff] }
 0x2dd   : >> { %2090 = vmatprep.subr.bf16.mxu1 %v2089_v33  ;;  %vm3419_vm1 = vmpackc.low %vm1131_vm15, %vm1130_vm13  ;;  %v3846_v33 = vld [vmem:[#allocation54_spill] sm:$0xff]  ;;  %v3852_v52 = vld [vmem:[#allocation57_spill] sm:$0xff] }
 0x2de   : >> { %v2097_v27 = vpack.c.bf16 %v3847_v30, %v3846_v33  ;;  %v3858_v33 = vld [vmem:[#allocation66_spill] sm:$0xff]  ;;  %v3859_v30 = vld [vmem:[#allocation68_spill] sm:$0xff] }
 0x2df   : >> { %1977 = vmatpush3.bf16.msk.msra.mxu0 %vm3385_vm5, %v2568_v36 }
 0x2e0   : >> { %1978 = vmatprep.subr.msk.bf16.mxu0 %vm3403_vm12, %v2568_v36  ;;  %2092 = vmatpush1.bf16.msra.mxu1 %v2091_v31  ;;  %v3849_v31 = vld [vmem:[#allocation55_spill] sm:$0xff] }
 0x2e1   : >> { %2094 = vmatprep.subr.bf16.mxu1 %v2093_v42  ;;  %v2099_v40 = vpack.c.bf16 %v3849_v31, %v3848_v41  ;;  %v2105_v42 = vpack.c.bf16 %v3855_v29, %v3854_v61  ;;  %v3860_v41 = vld [vmem:[#allocation65_spill] sm:$0xff]  ;;  %v3861_v31 = vld [vmem:[#allocation67_spill] sm:$0xff]  ;;  %v3866_v61 = vld [vmem:[#allocation74_spill] sm:$0xff] }
 0x2e2   : >> { %v3867_v29 = vld [vmem:[#allocation76_spill] sm:$0xff] }
 0x2e3   : >> { %1979 = vmatpush3.bf16.msk.msra.mxu0 %vm3403_vm12, %v2568_v36 }
 0x2e4   : >> { %1980 = vmatprep.subr.msk.bf16.mxu0 %vm3419_vm1, %v2568_v36  ;;  %2096 = vmatpush1.bf16.msra.mxu1 %v2095_v44  ;;  %v2107_v44 = vpack.c.bf16 %v3857_v38, %v3856_v45  ;;  %v3868_v45 = vld [vmem:[#allocation73_spill] sm:$0xff]  ;;  %v3869_v38 = vld [vmem:[#allocation75_spill] sm:$0xff] }
 0x2e5   : >> { %2098 = vmatprep.subr.bf16.mxu1 %v2097_v27  ;;  %v2109_v27 = vpack.c.bf16 %v3859_v30, %v3858_v33  ;;  %v3870_v33 = vld [vmem:[#allocation78_spill] sm:$0xff]  ;;  %v3871_v30 = vld [vmem:[#allocation80_spill] sm:$0xff] }
 0x2e7   : >> { %1981 = vmatpush3.bf16.msk.msra.mxu0 %vm3419_vm1, %v2568_v36 }
 0x2e8   : >> { %2129 = vmatprep.subr.bf16.mxu0 %v2565_v28  ;;  %2100 = vmatpush1.bf16.msra.mxu1 %v2099_v40  ;;  %v2111_v40 = vpack.c.bf16 %v3861_v31, %v3860_v41  ;;  %v3872_v41 = vld [vmem:[#allocation77_spill] sm:$0xff]  ;;  %v3873_v31 = vld [vmem:[#allocation79_spill] sm:$0xff] }
 0x2ea   : >> { %1983 = vmatmul.mubr.bf16.vlgmr.msra.gmra.mrb[4].mxu0 %v3840_v56  ;;  %v3853_v56 = vld [vmem:[#allocation59_spill] sm:$0xff] }
 0x2eb   : >> { %2131 = vmatpush3.bf16.msk.msra.mxu0 %vm3305_vm6, %v2568_v36  ;;  %2018 = vmatprep.mubr.msk.f32.mxu0 %vm2566_vm0, %v2567_v32 }
 0x2ec   : >> { %2132 = vmatprep.subr.bf16.mxu0 %v2565_v28 }
 0x2ef   : >> { %2134 = vmatpush3.bf16.msk.msra.mxu0 %vm3314_vm7, %v2568_v36 }
 0x2f0   : >> { %2135 = vmatprep.subr.bf16.mxu0 %v2565_v28 }
 0x2f3   : >> { %2137 = vmatpush3.bf16.msk.msra.mxu0 %vm3331_vm11, %v2568_v36 }
 0x2f4   : >> { %2138 = vmatprep.subr.bf16.mxu0 %v2565_v28 }
 0x2f7   : >> { %2140 = vmatpush3.bf16.msk.msra.mxu0 %vm3349_vm14, %v2568_v36 }
 0x2f8   : >> { %2141 = vmatprep.subr.bf16.mxu0 %v2565_v28 }
 0x2fb   : >> { %2143 = vmatpush3.bf16.msk.msra.mxu0 %vm3367_vm2, %v2568_v36 }
 0x2fc   : >> { %2144 = vmatprep.subr.bf16.mxu0 %v2565_v28 }
 0x2ff   : >> { %2146 = vmatpush3.bf16.msk.msra.mxu0 %vm3385_vm5, %v2568_v36 }
 0x300   : >> { %2147 = vmatprep.subr.bf16.mxu0 %v2565_v28 }
 0x303   : >> { %2149 = vmatpush3.bf16.msk.msra.mxu0 %vm3403_vm12, %v2568_v36 }
 0x304   : >> { %2150 = vmatprep.subr.bf16.mxu0 %v2565_v28 }
 0x307   : >> { %2152 = vmatpush3.bf16.msk.msra.mxu0 %vm3419_vm1, %v2568_v36  ;;  %v3851_v36 = vld [vmem:[#allocation60_spill] sm:$0xff] }
 0x308   : >> { %v2101_v9 = vpack.c.bf16 %v3851_v36, %v3850_v34  ;;  %v3862_v34 = vld [vmem:[#allocation70_spill] sm:$0xff]  ;;  %v3863_v36 = vld [vmem:[#allocation72_spill] sm:$0xff] }
 0x30a   : >> { %2019 = vmatmul.mubr.f32.vlgmr.msra.gmra.mrb[2].mxu0 %v3841_v53  ;;  %v2103_v53 = vpack.c.bf16 %v3853_v56, %v3852_v52  ;;  %2102 = vmatprep.subr.bf16.mxu1 %v2101_v9  ;;  %v2113_v9 = vpack.c.bf16 %v3863_v36, %v3862_v34  ;;  %v3864_v52 = vld [vmem:[#allocation69_spill] sm:$0xff]  ;;  %v3865_v56 = vld [vmem:[#allocation71_spill] sm:$0xff]  ;;  %v3874_v34 = vld [vmem:[#allocation82_spill] sm:$0xff] }
 0x30b   : >> { %v3875_v36 = vld [vmem:[#allocation84_spill] sm:$0xff] }
 0x30c   : >> { %2104 = vmatpush1.bf16.msra.mxu1 %v2103_v53  ;;  %v2115_v53 = vpack.c.bf16 %v3865_v56, %v3864_v52  ;;  %v3876_v52 = vld [vmem:[#allocation81_spill] sm:$0xff]  ;;  %v3877_v56 = vld [vmem:[#allocation83_spill] sm:$0xff] }
 0x30d   : >> { %2106 = vmatprep.subr.bf16.mxu1 %v2105_v42  ;;  %v2117_v42 = vpack.c.bf16 %v3867_v29, %v3866_v61  ;;  %v2127_v61 = vpack.c.bf16 %v3877_v56, %v3876_v52 }
 0x310   : >> { %2108 = vmatpush1.bf16.msra.mxu1 %v2107_v44  ;;  %v2119_v44 = vpack.c.bf16 %v3869_v38, %v3868_v45 }
 0x311   : >> { %2110 = vmatprep.subr.bf16.mxu1 %v2109_v27  ;;  %v2121_v27 = vpack.c.bf16 %v3871_v30, %v3870_v33 }
 0x314   : >> { %2112 = vmatpush1.bf16.msra.mxu1 %v2111_v40  ;;  %v2123_v40 = vpack.c.bf16 %v3873_v31, %v3872_v41 }
 0x315   : >> { %2114 = vmatprep.subr.bf16.mxu1 %v2113_v9  ;;  %v2125_v9 = vpack.c.bf16 %v3875_v36, %v3874_v34 }
 0x318   : >> { %2116 = vmatpush1.bf16.msra.mxu1 %v2115_v53  ;;  %v1011_v53 = vstv %s2877_s9  ;;  %s2570_s9 = smov (%p930_p13), [#allocation13]  }
 0x319   : >> { %2118 = vmatprep.subr.bf16.mxu1 %v2117_v42  ;;  %v1013_v42 = vstv %s2885_s14  ;;  %s2439_s14 = sshll.u32 (%p930_p13), %s2570_s9, 4  ;;  %s2440_s14 = int_to_ptr.vmem [resolvable:$false] %s2439_s14 }
 0x31a   : > { %s2441_s8 = scalar_lea.vmem (%p930_p13), %s2440_s14, 1024  ;;  %p2442_p3 = scmp.lt.s32.totalorder (%p930_p13), %s3577_s30, %s2440_s14 }
 0x31b   : > { %p2443_p9 = scmp.lt.s32.totalorder (%p930_p13), %s2441_s8, %s2435_s23 }
 0x31c   : >> { %2120 = vmatpush1.bf16.msra.mxu1 %v2119_v44 }
 0x31d   : >> { %2122 = vmatprep.subr.bf16.mxu1 %v2121_v27  ;;  %p2444_p11 = por (%p930_p13), %p2443_p9, %p2442_p3 }
 0x31f   : > { %p2445_p2 = pnand (%p930_p13), %p2444_p11, %p2438_p7 }
 0x320   : >> { %2124 = vmatpush1.bf16.msra.mxu1 %v2123_v40 }
 0x321   : >> { %2126 = vmatprep.subr.bf16.mxu1 %v2125_v9 }
 0x324   : >> { %2128 = vmatpush1.bf16.msra.mxu1 %v2127_v61 }
 0x325   : >> { %2153 = vmatprep.subr.bf16.mxu1 %v2565_v28 }
 0x39c   : >> { %v1007_v29 = vpop.f32.mrb[0].mxu0 }
 0x39d   : >> { %v1012_v45 = vadd.f32 %v1011_v53, %v1007_v29  ;;  %v1965_v38 = vpop.f32.mrb[1].mxu0  ;;  %v1014_v44 = vadd.f32 %v1013_v42, %v1007_v29 }
 0x39f   : >> { %v1016_v33 = vrot.slane %v1012_v45, 7  ;;  %v3878_v45 = vld [vmem:[#allocation90_spill] sm:$0xff] }
 0x3a1   : >> { %v1018_v30 = vsub.f32 %v1014_v44, %v1016_v33 }
 0x3a3   : >> { %v1019_v27 = vmul.f32 1.442695, %v1018_v30 }
 0x3a5   : >> { %2292 = vpow2.f32 %v1019_v27 }
 0x3af   : >> { %v2293_v41 = vpop.eup %2292 }
 0x3b0   : >> { %v1021_v31 = vadd.f32 1.0, %v2293_v41 }
 0x3b2   : >> { %2294 = vrcp.f32 %v1021_v31 }
 0x3bc   : >> { %v2295_v40 = vpop.eup %2294 }
 0x3bd   : >> { %v1023_v34 = vsub.f32 1.0, %v2295_v40  ;;  %v3507_v36 = vpop.f32.mrb[4].mxu0  ;;  %v1026_v61 = vrot.slane %v2295_v40, 1 }
 0x3be   : >> { %v3509_v9 = vpop.f32.mrb[5].mxu0  ;;  %v1439_v33 = vsub.f32 %v3507_v36, %v2545_v43 }
 0x3bf   : >> { %v1027_v52 = vrot.slane %v1023_v34, 1  ;;  %v3511_v56 = vpop.f32.mrb[6].mxu0  ;;  %v1377_v30 = vsub.f32 %v3509_v9, %v2545_v43  ;;  %v1103_v34 = vsub.s32 0, %v2942_v35 }
 0x3c0   : >> { %v2157_v53 = vpack.c.bf16 %v3511_v56, %v3507_v36  ;;  %v3515_v29 = vpop.f32.mrb[7].mxu0  ;;  %v1478_v27 = vsub.f32 %v3511_v56, %v2545_v43 }
 0x3c1   : >> { %1094 = vmatprep.mubr.f32.mxu1 %v1027_v52  ;;  %v2154_v42 = vpack.c.bf16 %v3515_v29, %v3509_v9  ;;  %v1385_v41 = vmul.f32 %v1377_v30, %v1377_v30 }
 0x3c2   : >> { %1095 = vmatmul.mubr.f32.vlgmr.msra.gmra.mrb[0].mxu1 %v1026_v61  ;;  %v1486_v31 = vmul.f32 %v1478_v27, %v1478_v27 }
 0x3c3   : >> { %2155 = vmatpush3.bf16.msra.mxu1 %v2154_v42  ;;  %2029 = vmatprep.mubr.msk.f32.mxu1 %vm2566_vm0, %v2567_v32  ;;  %v1400_v32 = vsub.f32 %v3515_v29, %v2545_v43 }
 0x3c4   : >> { %2156 = vmatprep.subr.bf16.mxu1 %v2565_v28  ;;  %v1447_v28 = vmul.f32 %v1439_v33, %v1439_v33  ;;  %v1487_v42 = vrot.slane %v1486_v31, 4 }
 0x3c5   : >> { %v1408_v40 = vmul.f32 %v1400_v32, %v1400_v32 }
 0x3c6   : >> { %v1448_v52 = vrot.slane %v1447_v28, 4  ;;  %v1488_v5 = vadd.f32 %v1487_v42, %v1486_v31 }
 0x3c7   : >> { %2158 = vmatpush3.bf16.msra.mxu1 %v2157_v53  ;;  %v1386_v53 = vrot.slane %v1385_v41, 4 }
 0x3c8   : >> { %v1449_v3 = vadd.f32 %v1448_v52, %v1447_v28 }
 0x3c9   : >> { %v1387_v4 = vadd.f32 %v1386_v53, %v1385_v41 }
 0x3ca   : >> { %2030 = vmatmul.mubr.msk.f32.vlgmr.msra.gmra.mrb[2].mxu1 %vm804_vm9, %v3878_v45  ;;  %v1409_v45 = vrot.slane %v1408_v40, 4 }
 0x3cb   : >> { %v1388_v12 = vrot.slane %v1387_v4, 2 }
 0x3cc   : >> { %v1410_v6 = vadd.f32 %v1409_v45, %v1408_v40 }
 0x3cd   : >> { %v1389_v53 = vadd.f32 %v1388_v12, %v1387_v4 }
 0x3dd   : >> { %v3524_v38 = vpop.f32.mrb[2].mxu0 }
 0x3de   : >> { %v2020_v44 = vpop.f32.mrb[3].mxu0 }
 0x495   : >> { %v1096_v61 = vpop.f32.mrb[0].mxu1 }
 0x496   : >> { %v1104_v44 = vrot.slane %v1096_v61, %v1103_v34  ;;  %v1098_v39 = vpop.f32.mrb[1].mxu1  ;;  %v1450_v61 = vrot.slane %v1449_v3, 2 }
 0x497   : >> { %v1109_v0 = vrot.slane %v1098_v39, %v1103_v34  ;;  %v1489_v39 = vrot.slane %v1488_v5, 2  ;;  %v1411_v34 = vrot.slane %v1410_v6, 2 }
 0x498   : >> { %v1105_v1 = vmul.f32 %v2545_v43, %v1104_v44 }
 0x499   : >> { %v1110_v2 = vmul.f32 %v2541_v37, %v1109_v0  ;;  %v1412_v42 = vadd.f32 %v1411_v34, %v1410_v6 }
 0x49b   : >> { %v3537_v37 = vadd.f32 %v1110_v2, %v1105_v1   ;;  %v1451_v2 = vadd.f32 %v1450_v61, %v1449_v3 }
 0x49d   : >> { %v1291_v8 = vmul.f32 %v3537_v37, %v3879_v7  ;;  %v1369_v10 = vsub.f32 %v2545_v43, %v3537_v37  ;;  %v1364_v11 = vpop.f32.mrb[2].mxu1  ;;  %v1490_v7 = vadd.f32 %v1489_v39, %v1488_v5  ;;  %v1452_v15 = vrot.slane %v1451_v2, 1 }
 0x49e   : >> { %v2031_v44 = vpop.f32.mrb[3].mxu1 }
 0x49f   : >> { %v1370_v13 = vmul.f32 %v1369_v10, %v1369_v10  ;;  %v1378_v0 = vmul.f32 %v1377_v30, %v1369_v10  ;;  %v1401_v28 = vmul.f32 %v1400_v32, %v1369_v10  ;;  %v1440_v41 = vmul.f32 %v1439_v33, %v1369_v10 }
 0x4a0   : >> { %v1479_v31 = vmul.f32 %v1478_v27, %v1369_v10  ;;  %v1292_v40 = vrot.slane %v1291_v8, 4  ;;  %v1390_v44 = vrot.slane %v1389_v53, 1  ;;  %v1491_v19 = vrot.slane %v1490_v7, 1 }
 0x4a1   : >> { %v1371_v1 = vrot.slane %v1370_v13, 4  ;;  %v1379_v17 = vrot.slane %v1378_v0, 4  ;;  %v1402_v18 = vrot.slane %v1401_v28, 4  ;;  %v1413_v30 = vrot.slane %v1412_v42, 1 }
 0x4a2   : >> { %v1293_v52 = vadd.f32 %v1292_v40, %v1291_v8  ;;  %v1441_v10 = vrot.slane %v1440_v41, 4  ;;  %v1480_v27 = vrot.slane %v1479_v31, 4  ;;  %v1453_v3 = vadd.f32 %v1452_v15, %v1451_v2 }
 0x4a3   : >> { %v1372_v45 = vadd.f32 %v1371_v1, %v1370_v13  ;;  %v1380_v4 = vadd.f32 %v1379_v17, %v1378_v0  ;;  %v1403_v5 = vadd.f32 %v1402_v18, %v1401_v28  ;;  %v1391_v6 = vadd.f32 %v1390_v44, %v1389_v53 }
 0x4a4   : >> { %v1294_v43 = vrot.slane %v1293_v52, 2  ;;  %v1492_v12 = vadd.f32 %v1491_v19, %v1490_v7  ;;  %v1414_v13 = vadd.f32 %v1413_v30, %v1412_v42  ;;  %v1442_v34 = vadd.f32 %v1441_v10, %v1440_v41 }
 0x4a5   : >> { %v1373_v14 = vrot.slane %v1372_v45, 2  ;;  %v1481_v40 = vadd.f32 %v1480_v27, %v1479_v31 }
 0x4a6   : >> { %v1295_v16 = vadd.f32 %v1294_v43, %v1293_v52  ;;  %v1443_v15 = vrot.slane %v1442_v34, 2 }
 0x4a7   : >> { %v1374_v32 = vadd.f32 %v1373_v14, %v1372_v45  ;;  %v1381_v14 = vrot.slane %v1380_v4, 2  ;;  %v1404_v45 = vrot.slane %v1403_v5, 2  ;;  %v1482_v17 = vrot.slane %v1481_v40, 2 }
 0x4a8   : >> { %v1296_v33 = vrot.slane %v1295_v16, 1 }
 0x4a9   : >> { %v1375_v20 = vrot.slane %v1374_v32, 1  ;;  %v1382_v18 = vadd.f32 %v1381_v14, %v1380_v4  ;;  %v1405_v19 = vadd.f32 %v1404_v45, %v1403_v5  ;;  %v1436_v45 = vrot.slane %v3524_v38, 7 }
 0x4aa   : >> { %v1297_v8 = vadd.f32 %v1296_v33, %v1295_v16 }
 0x4ab   : >> { %v1376_v61 = vadd.f32 %v1375_v20, %v1374_v32  ;;  %v1483_v20 = vadd.f32 %v1482_v17, %v1481_v40  ;;  %v1383_v0 = vrot.slane %v1382_v18, 1  ;;  %v1406_v28 = vrot.slane %v1405_v19, 1 }
 0x4ac   : >> { %v1365_v39 = vadd.f32 %v1364_v11, %v1297_v8  ;;  %v1444_v11 = vadd.f32 %v1443_v15, %v1442_v34 }
 0x4ad   : >> { %v1392_v1 = vmul.f32 %v1391_v6, %v1376_v61  ;;  %v1415_v52 = vmul.f32 %v1414_v13, %v1376_v61  ;;  %v1454_v43 = vmul.f32 %v1453_v3, %v1376_v61  ;;  %v1493_v21 = vmul.f32 %v1492_v12, %v1376_v61 }
 0x4ae   : >> { %v1445_v41 = vrot.slane %v1444_v11, 1  ;;  %v1484_v31 = vrot.slane %v1483_v20, 1  ;;  %v1384_v2 = vadd.f32 %v1383_v0, %v1382_v18  ;;  %v1407_v7 = vadd.f32 %v1406_v28, %v1405_v19 }
 0x4af   : >> { %v1393_v22 = vmax.f32 %v1392_v1, 1e-16  ;;  %v1416_v23 = vmax.f32 %v1415_v52, 1e-16  ;;  %v1455_v24 = vmax.f32 %v1454_v43, 1e-16  ;;  %v3880_v6 = vstv %s3244_s22 }
 0x4b0   : >> { %v1494_v16 = vmax.f32 %v1493_v21, 1e-16  ;;  %v1446_v21 = vadd.f32 %v1445_v41, %v1444_v11  ;;  %v1485_v32 = vadd.f32 %v1484_v31, %v1483_v20  ;;  %v1368_v12 = vadd.f32 %v1365_v39, %v3880_v6 }
 0x4b1   : >> { %2296 = vrsqrt.f32 %v1393_v22  ;;  %v2569_v19 = vmov 0   ;;  %v3881_v20 = vsub.s32 1, %v2942_v35 }
 0x4b2   : >> { %2298 = vrsqrt.f32 %v1416_v23 }
 0x4b3   : >> { %2300 = vrsqrt.f32 %v1455_v24 }
 0x4b4   : >> { %2302 = vrsqrt.f32 %v1494_v16 }
 0x4bb   : >> { %v2297_v53 = vpop.eup %2296 }
 0x4bc   : >> { %v2299_v42 = vpop.eup %2298  ;;  %v1395_v44 = vmul.f32 %v2297_v53, %v1384_v2 }
 0x4bd   : >> { %v2301_v22 = vpop.eup %2300  ;;  %v1418_v30 = vmul.f32 %v2299_v42, %v1407_v7  ;;  %v3882_v42 = vsub.s32 2, %v2942_v35 }
 0x4be   : >> { %v2303_v23 = vpop.eup %2302  ;;  %v1396_v33 = vadd.f32 1.0, %v1395_v44  ;;  %v1457_v24 = vmul.f32 %v2301_v22, %v1446_v21 }
 0x4bf   : >> { %v1419_v10 = vadd.f32 1.0, %v1418_v30  ;;  %v1496_v27 = vmul.f32 %v2303_v23, %v1485_v32 }
 0x4c0   : >> { %v1397_v3 = vmax.f32 %v1396_v33, 0.0  ;;  %v1458_v8 = vadd.f32 1.0, %v1457_v24 }
 0x4c1   : >> { %v1420_v4 = vmax.f32 %v1419_v10, 0.0  ;;  %v1497_v5 = vadd.f32 1.0, %v1496_v27 }
 0x4c2   : >> { %v1398_v13 = vmin.f32 %v1397_v3, 1.0  ;;  %v1459_v61 = vmax.f32 %v1458_v8, 0.0 }
 0x4c3   : >> { %v1421_v34 = vmin.f32 %v1420_v4, 1.0  ;;  %v1498_v40 = vmax.f32 %v1497_v5, 0.0 }
 0x4c4   : >> { %v1399_v1 = vmul.f32 %v1398_v13, %v1368_v12  ;;  %v1460_v52 = vmin.f32 %v1459_v61, 1.0 }
 0x4c5   : >> { %v1422_v43 = vmul.f32 %v1421_v34, %v1368_v12  ;;  %v1499_v14 = vmin.f32 %v1498_v40, 1.0 }
 0x4c6   : >> { %v1424_v15 = vrot.slane %v1399_v1, 7  ;;  %v1461_v16 = vmul.f32 %v1460_v52, %v1368_v12 }
 0x4c7   : >> { %v1500_v17 = vmul.f32 %v1499_v14, %v1368_v12 }
 0x4c8   : >> { %vm1426_vm0 = vcmp.gt.f32.partialorder %v1422_v43, %v1424_v15 }
 0x4c9   : >> { %v1427_v18 = vsel %vm1426_vm0, %v1422_v43, %v1424_v15  ;;  %v1428_v11 = vsel %vm1426_vm0, 1, %v2569_v19  ;;  %v1438_v39 = vsel %vm1426_vm0, %v3524_v38, %v1436_v45 }
 0x4ca   : >> { %v1432_v0 = vrot.slane %v1428_v11, %v3881_v20  ;;  %v1463_v28 = vrot.slane %v1427_v18, 7  ;;  %v1475_v41 = vrot.slane %v1438_v39, 7 }
 0x4cc   : >> { %vm1433_vm6 = vcmp.eq.s32.totalorder %v1432_v0, 1  ;;  %vm1465_vm7 = vcmp.gt.f32.partialorder %v1461_v16, %v1463_v28 }
 0x4cd   : >> { %v1434_v31 = vsel %vm1433_vm6, %v3515_v29, %v3509_v9  ;;  %v1466_v2 = vsel %vm1465_vm7, %v1461_v16, %v1463_v28  ;;  %v1467_v53 = vsel %vm1465_vm7, 1, %v2569_v19  ;;  %v1477_v7 = vsel %vm1465_vm7, %v3524_v38, %v1475_v41 }
 0x4ce   : >> { %v1471_v44 = vrot.slane %v1467_v53, %v3882_v42  ;;  %v1502_v21 = vrot.slane %v1466_v2, 7  ;;  %v1513_v22 = vrot.slane %v1477_v7, 7 }
 0x4d0   : >> { %vm1472_vm11 = vcmp.eq.s32.totalorder %v1471_v44, 1  ;;  %vm1504_vm14 = vcmp.gt.f32.partialorder %v1500_v17, %v1502_v21  ;;  %932 = sbr.rel (!%p930_p13) target bundleno = 708 (0x2c4), region = 145 }
 0x4d1   : >> { %v1473_v30 = vsel %vm1472_vm11, %v3507_v36, %v1434_v31  ;;  %v1505_v32 = vsel %vm1504_vm14, 1, %v2569_v19  ;;  %v1515_v33 = vsel %vm1504_vm14, %v3524_v38, %v1513_v22  }
 0x4d2   : >> { %v1509_v23 = vrot.slane %v1505_v32, %v3258_v47 }
 0x4d4   : >> { %vm1510_vm2 = vcmp.eq.s32.totalorder %v1509_v23, 1 }
 0x4d5   : >> { %v1511_v43 = vsel %vm1510_vm2, %v3511_v56, %v1473_v30  }
 0x4d6   : >> { %1518 = vst [vmem:[%s1517_s0] sm:$0xff] %v1511_v43 }
 0x4d7   : > { %2448 = shalt.err (!%p2445_p2)
}
 0x4d8   : > { %s2449_s12 = scalar_lea.hbm %s3574_s13, 512  ;;  %s2453_s27 = scalar_lea.hbm %s3631_s10, 1024 }
 0x4d9   : > { %p2450_p10 = scmp.ne.s32.totalorder %s3574_s13, %s2449_s12  ;;  %p2454_p6 = scmp.lt.u32.totalorder %s3574_s13, %s3631_s10 }
 0x4da   : > { %p2455_p8 = scmp.lt.u32.totalorder %s2453_s27, %s2449_s12  ;;  %p2457_p4 = scmp.lt.u32.totalorder %s2449_s12, %s3574_s13 }
 0x4db   : > { %p2451_p12 = pnand %p2450_p10, %p3883_p0 }
 0x4dc   : > { %p2456_p13 = por %p2455_p8, %p2454_p6 }
 0x4dd   : > { %p2452_p1 = pneg %p2451_p12 }
 0x4de   : > { %p2458_p5 = por %p2457_p4, %p2456_p13 }
 0x4e0   : > { %p2459_p7 = pnand %p2458_p5, %p2452_p1 }
 0x4e2   : > { %2462 = shalt.err (!%p2459_p7)
}
 0x4e3   : > { %s2571_s25 = smov 128   ;;  %s2572_s0 = smov 8  }
 0x4e4   : > { %2175 = dma.vmem_to_hbm [thread:$0]  (%p3883_p0), %s3577_s30, 512, %s3574_s13, %s1520_s24, %s2571_s25, %s2571_s25, %s2572_s0  }
 0x4e5 PF: > { %s1548_s11 = sand.u32 1, %s2521_s15   ;;  %p3884_p3 = scmp.ne.s32.totalorder %s3665_s21, 0 }
 0x4e6   : > { %p3885_p9 = scmp.ge.s32.totalorder %s2533_s18, 2  ;;  %s1549_s4 = scalar_lea.sflag [#allocation5], %s1548_s11 }
 0x4e8   : > { %p2195_p11 = pnand %p3885_p9, %p3884_p3 }
 0x4ea   : > { %2516 = dma.done.wait (!%p2195_p11), %s1549_s4, 512  }
 0x4eb   : > { %2518 = vsyncadd (!%p2195_p11), %s1549_s4, 4294966784  ;;  %s3886_s29 = sld [smem:[#allocation20_spill]]  ;;  %s3887_s17 = sld [smem:[#allocation21_spill]] }
 0x4ec   : > { %p29_p2 = scmp.ge.s32.totalorder %s2748_s26, 4   ;;  %s3888_s15 = smov %s2525_s16 }
 0x4ed   : > { %s3890_s18 = smov %s2748_s26 }
 0x4ee   :  { %31 = sbr.rel (!%p29_p2) target bundleno = 15 (0xf), region = 156 }
 0x4f1   : > { %s3889_s16 = smov %s3886_s29 }
 0x4f5   :  { %1554 = vsyncpa [#allocation4], 1 }
 0x4f6   :  { %1556 = vsyncpa [#allocation4 + $0x1], 1 }
 0x4f7   :  { %1557 = vsyncpa [#allocation8], 1 }
 0x4f8   :  { %1559 = vsyncpa [#allocation8 + $0x1], 1 }
 0x4f9   :  { %1560 = vsyncpa [#allocation11], 1 }
 0x4fa   :  { %1561 = vsyncpa [#allocation5], 1 }
 0x4fb   :  { %1563 = vsyncpa [#allocation5 + $0x1], 1 }
 0x4fc   :  { %1564 = vsyncpa [#allocation6], 1 }
 0x4fd   :  { %1566 = vsyncpa [#allocation6 + $0x1], 1 }

</bundles_post_ra>
